<compile_context>
chip_gen: v6e
topology: v6e:2x2x1
jax: 0.10.0
libtpu: 0.0.40
codegen_flags: <defaults>
</compile_context>

<pallas_src>
import functools

import jax
import jax.numpy as jnp
from jax import lax
from jax.experimental import pallas as pl
from jax.experimental.pallas import tpu as pltpu

MIN_LOG_STD = -20.0
MAX_LOG_STD = 2.0


def _actor_kernel(state_ref, la_ref, h0_ref, c0_ref,
                  wsf_ref, bsf_ref, wl1a_ref,
                  wih_ref, whh_ref, blstm_ref,
                  w2a_ref, w2b_ref, b2_ref, w3_ref, b3_ref,
                  whead_ref, bhead_ref,
                  heads_ref, h_out_ref, c_out_ref,
                  work_ref, pre2a_ref):
    """Whole Actor forward (all timesteps) in one kernel invocation.

    Layout: time-major, batch padded to a multiple of 8 and flattened:
      state_ref : (T*Bp, S)  rows [t*Bp, (t+1)*Bp) hold timestep t   (bf16)
      la_ref    : (T*Bp, A)                                           (bf16)
      h0/c0     : (Bp, 4H)   valid data in lanes [0, H), zeros elsewhere
      heads_ref : (T*Bp, 2A) lanes [0, A) = mu, lanes [A, 2A) = clipped log_std
      work_ref  : (T*Bp, 4H) fused i|f|g|o input preactivation before the
                  recurrence, (lane-padded) hidden states after it.
    """
    Bp, H4 = h0_ref.shape
    H = H4 // 4
    TB = state_ref.shape[0]
    T = TB // Bp
    A = heads_ref.shape[1] // 2
    f32 = jnp.float32
    bf16 = jnp.bfloat16

    # ---------- hoisted, time-independent projections (bulk, bf16 MXU) ----------
    # [fc1 | lstm1(state-half)] in one lane-fused matmul; biases pre-fused.
    sp = (jnp.dot(state_ref[...], wsf_ref[...], preferred_element_type=f32)
          + bsf_ref[...])                                          # (T*Bp, 2H)
    x1 = jnp.maximum(sp[:, :H], 0.0)                               # relu(fc1)
    x2 = jnp.maximum(
        sp[:, H:] + jnp.dot(la_ref[...], wl1a_ref[...],
                            preferred_element_type=f32), 0.0)      # relu(lstm1)
    # x1-half of fc2 (the h-half is added after the loop).
    pre2a_ref[...] = jnp.dot(x1.astype(bf16), w2a_ref[...],
                             preferred_element_type=f32)
    # Fused i|f|g|o LSTM input preactivation with folded biases: (T*Bp, 4H).
    work_ref[...] = (jnp.dot(x2.astype(bf16), wih_ref[...],
                             preferred_element_type=f32) + blstm_ref[...])

    # ---------- serial LSTM recurrence (f32): one tiny matmul per step ----------
    whh = whh_ref[...]                                 # (H, 4H), loop-invariant
    lane = lax.broadcasted_iota(jnp.int32, (Bp, H4), 1)
    g_lane = (lane >= 2 * H) & (lane < 3 * H)          # tanh lanes (g gate)

    def step(t, carry):
        h_full, c_full = carry                         # (Bp, 4H); lanes [0,H) valid
        row = pl.multiple_of(t * Bp, 8)
        gates = (work_ref[pl.ds(row, Bp), :]
                 + jnp.dot(h_full[:, :H], whh, preferred_element_type=f32))
        # One sigmoid + one tanh over the full 128-lane vreg, gate-selected by mask.
        act = jnp.where(g_lane, jnp.tanh(gates), jax.nn.sigmoid(gates))
        # np.roll semantics: out[l] = act[(l - shift) mod 4H]; the shifts below
        # bring the f / g / o quarters onto lanes [0, H) (where i already lives).
        f_al = pltpu.roll(act, 3 * H, 1)
        g_al = pltpu.roll(act, 2 * H, 1)
        o_al = pltpu.roll(act, H, 1)
        c_new = f_al * c_full + act * g_al             # lanes [0,H): f*c + i*g
        h_new = o_al * jnp.tanh(c_new)                 # lanes [0,H): o*tanh(c)
        # Full-width (unmasked) store; re-uses this step's preactivation rows.
        work_ref[pl.ds(row, Bp), :] = h_new
        return (h_new, c_new)

    h_fin, c_fin = lax.fori_loop(0, T, step, (h0_ref[...], c0_ref[...]),
                                 unroll=min(T, 8))
    h_out_ref[...] = h_fin                             # wrapper keeps lanes [0,H)
    c_out_ref[...] = c_fin

    # ---------- post-loop bulk back-end: fc2, fc3, fused heads ----------
    hall = work_ref[...].astype(bf16)                  # (T*Bp, 4H); junk past H
    x = jnp.maximum(
        pre2a_ref[...]
        + jnp.dot(hall, w2b_ref[...], preferred_element_type=f32)  # zero-padded rows
        + b2_ref[...], 0.0)
    x = jnp.maximum(
        jnp.dot(x.astype(bf16), w3_ref[...], preferred_element_type=f32)
        + b3_ref[...], 0.0)
    head = (jnp.dot(x.astype(bf16), whead_ref[...], preferred_element_type=f32)
            + bhead_ref[...])                          # (T*Bp, 2A) = [mu | log_std]
    hl = lax.broadcasted_iota(jnp.int32, head.shape, 1)
    ls = jnp.clip(jnp.maximum(head, 0.0), MIN_LOG_STD, MAX_LOG_STD)
    heads_ref[...] = jnp.where(hl < A, head, ls)


def init_actor_params(key, state_dim, action_dim, hidden_dim):
    """Deterministic parameter init with PyTorch-like shapes (row-major W)."""
    H = hidden_dim
    ks = jax.random.split(key, 16)

    def u(k, shape, fan_in):
        bound = 1.0 / jnp.sqrt(float(fan_in))
        return jax.random.uniform(k, shape, jnp.float32, -bound, bound)

    return {
        "fc1_w": u(ks[0], (H, state_dim), state_dim),
        "fc1_b": u(ks[1], (H,), state_dim),
        "lstm1_w": u(ks[2], (H, state_dim + action_dim), state_dim + action_dim),
        "lstm1_b": u(ks[3], (H,), state_dim + action_dim),
        # nn.LSTM(hidden_dim, hidden_dim): weight_ih (4H, H), weight_hh (4H, H)
        "lstm_wih": u(ks[4], (4 * H, H), H),
        "lstm_whh": u(ks[5], (4 * H, H), H),
        "lstm_bih": u(ks[6], (4 * H,), H),
        "lstm_bhh": u(ks[7], (4 * H,), H),
        "fc2_w": u(ks[8], (H, 2 * H), 2 * H),
        "fc2_b": u(ks[9], (H,), 2 * H),
        "fc3_w": u(ks[10], (H, H), H),
        "fc3_b": u(ks[11], (H,), H),
        "mu_w": u(ks[12], (action_dim, H), H),
        "mu_b": u(ks[13], (action_dim,), H),
        "ls_w": u(ks[14], (action_dim,), H) if False else u(ks[14], (action_dim, H), H),
        "ls_b": u(ks[15], (action_dim,), H),
    }


def _pack_kernel_weights(params):
    """Transpose / split / lane-fuse PyTorch-layout weights into kernel operands."""
    H, S = params["fc1_w"].shape
    A = params["mu_w"].shape[0]
    bf16 = jnp.bfloat16

    w1 = params["fc1_w"].T                       # (S, H)
    wl1 = params["lstm1_w"]                      # (H, S + A)
    wl1s = wl1[:, :S].T                          # (S, H)  acts on state
    wl1a = wl1[:, S:].T.astype(bf16)             # (A, H)  acts on last_action
    wsf = jnp.concatenate([w1, wl1s], axis=1).astype(bf16)            # (S, 2H)
    bsf = jnp.concatenate([params["fc1_b"],
                           params["lstm1_b"]]).reshape(1, 2 * H)      # (1, 2H)

    wih = params["lstm_wih"].T.astype(bf16)      # (H, 4H), columns i|f|g|o
    whh = params["lstm_whh"].T                   # (H, 4H) f32 (recurrence)
    blstm = (params["lstm_bih"] + params["lstm_bhh"]).reshape(1, 4 * H)

    w2 = params["fc2_w"]                         # (H, 2H)
    w2a = w2[:, :H].T.astype(bf16)               # (H, H)  acts on x1
    w2b = w2[:, H:].T                            # (H, H)  acts on LSTM h
    w2b_pad = jnp.concatenate(                   # (4H, H): zero rows kill junk lanes
        [w2b, jnp.zeros((3 * H, H), w2b.dtype)], axis=0).astype(bf16)
    b2 = params["fc2_b"].reshape(1, H)

    w3 = params["fc3_w"].T.astype(bf16)          # (H, H)
    b3 = params["fc3_b"].reshape(1, H)

    whead = jnp.concatenate([params["mu_w"].T,
                             params["ls_w"].T], axis=1).astype(bf16)  # (H, 2A)
    bhead = jnp.concatenate([params["mu_b"],
                             params["ls_b"]]).reshape(1, 2 * A)

    return (wsf, bsf, wl1a, wih, whh, blstm,
            w2a, w2b_pad, b2, w3, b3, whead, bhead)


@functools.partial(jax.jit, static_argnames=("hidden_dim",))
def actor_forward(params, state, last_action, hidden_in, *, hidden_dim):
    """Matches Actor.forward: state (B,T,S), last_action (B,T,A), hidden_in a
    pair of (1,B,H).  Returns (mu (B,T,A), log_std (B,T,A), (h_out, c_out))."""
    H = hidden_dim
    B, T, S = state.shape
    A = last_action.shape[-1]
    Bp = ((B + 7) // 8) * 8                      # pad batch to 8-sublane tile

    # batch-major -> time-major (matches the module's permute(1, 0, 2))
    state_t = jnp.transpose(state, (1, 0, 2))    # (T, B, S)
    la_t = jnp.transpose(last_action, (1, 0, 2))  # (T, B, A)
    h0 = hidden_in[0][0]                          # (B, H)
    c0 = hidden_in[1][0]                          # (B, H)

    pad = Bp - B
    if pad:
        state_t = jnp.pad(state_t, ((0, 0), (0, pad), (0, 0)))
        la_t = jnp.pad(la_t, ((0, 0), (0, pad), (0, 0)))
        h0 = jnp.pad(h0, ((0, pad), (0, 0)))
        c0 = jnp.pad(c0, ((0, pad), (0, 0)))

    state_2d = state_t.reshape(T * Bp, S).astype(jnp.bfloat16)
    la_2d = la_t.reshape(T * Bp, A).astype(jnp.bfloat16)
    # Widen h0/c0 to the 4H "gate-lane" layout used inside the kernel.
    h0w = jnp.pad(h0, ((0, 0), (0, 3 * H)))
    c0w = jnp.pad(c0, ((0, 0), (0, 3 * H)))

    weights = _pack_kernel_weights(params)
    kernel_inputs = (state_2d, la_2d, h0w, c0w) + weights
    vmem = pltpu.MemorySpace.VMEM

    heads2d, h_out_w, c_out_w = pl.pallas_call(
        _actor_kernel,
        out_shape=(
            jax.ShapeDtypeStruct((T * Bp, 2 * A), jnp.float32),   # [mu | log_std]
            jax.ShapeDtypeStruct((Bp, 4 * H), jnp.float32),       # h (lanes [0,H))
            jax.ShapeDtypeStruct((Bp, 4 * H), jnp.float32),       # c (lanes [0,H))
        ),
        in_specs=[pl.BlockSpec(memory_space=vmem)] * len(kernel_inputs),
        out_specs=(
            pl.BlockSpec(memory_space=vmem),
            pl.BlockSpec(memory_space=vmem),
            pl.BlockSpec(memory_space=vmem),
        ),
        scratch_shapes=[
            pltpu.VMEM((T * Bp, 4 * H), jnp.float32),   # preact -> hidden states
            pltpu.VMEM((T * Bp, H), jnp.float32),       # x1 @ w2a (fc2 x1-half)
        ],
    )(*kernel_inputs)

    heads = heads2d.reshape(T, Bp, 2 * A)[:, :B]                     # (T, B, 2A)
    mu = jnp.transpose(heads[..., :A], (1, 0, 2))                    # (B, T, A)
    ls = jnp.transpose(heads[..., A:], (1, 0, 2))                    # (B, T, A)
    hidden_out = (h_out_w[None, :B, :H], c_out_w[None, :B, :H])
    return mu, ls, hidden_out


def actor_forward_ref(params, state, last_action, hidden_in, hidden_dim):
    """Pure-JAX f32 reference of the same forward, for correctness checking."""
    H = hidden_dim
    state_t = jnp.transpose(state, (1, 0, 2))
    la_t = jnp.transpose(last_action, (1, 0, 2))

    x1 = jax.nn.relu(jnp.einsum("tbi,hi->tbh", state_t, params["fc1_w"])
                     + params["fc1_b"])
    x2 = jnp.concatenate([state_t, la_t], axis=-1)
    x2 = jax.nn.relu(jnp.einsum("tbi,hi->tbh", x2, params["lstm1_w"])
                     + params["lstm1_b"])

    wih, whh = params["lstm_wih"], params["lstm_whh"]
    b = params["lstm_bih"] + params["lstm_bhh"]

    def lstm_step(carry, x_t):
        h, c = carry
        gates = x_t @ wih.T + h @ whh.T + b
        i = jax.nn.sigmoid(gates[:, 0 * H:1 * H])
        f = jax.nn.sigmoid(gates[:, 1 * H:2 * H])
        g = jnp.tanh(gates[:, 2 * H:3 * H])
        o = jax.nn.sigmoid(gates[:, 3 * H:4 * H])
        c = f * c + i * g
        h = o * jnp.tanh(c)
        return (h, c), h

    (h_fin, c_fin), hs = lax.scan(lstm_step,
                                  (hidden_in[0][0], hidden_in[1][0]), x2)
    x = jnp.concatenate([x1, hs], axis=-1)
    x = jax.nn.relu(jnp.einsum("tbi,hi->tbh", x, params["fc2_w"])
                    + params["fc2_b"])
    x = jax.nn.relu(jnp.einsum("tbh,oh->tbo", x, params["fc3_w"])
                    + params["fc3_b"])
    x = jnp.transpose(x, (1, 0, 2))                                  # (B, T, H)
    mu = jnp.einsum("bth,oh->bto", x, params["mu_w"]) + params["mu_b"]
    ls = jax.nn.relu(jnp.einsum("bth,oh->bto", x, params["ls_w"])
                     + params["ls_b"])
    ls = jnp.clip(ls, MIN_LOG_STD, MAX_LOG_STD)
    return mu, ls, (h_fin[None], c_fin[None])


if __name__ == "__main__":
    state_dim, action_dim, hidden_dim = 16, 4, 32
    B, T = 2, 8

    key = jax.random.PRNGKey(0)
    kp, ks, kla, kh, kc = jax.random.split(key, 5)

    params = init_actor_params(kp, state_dim, action_dim, hidden_dim)
    state = jax.random.normal(ks, (B, T, state_dim), jnp.float32)
    last_action = jax.random.normal(kla, (B, T, action_dim), jnp.float32)
    hidden_in = (jax.random.normal(kh, (1, B, hidden_dim), jnp.float32),
                 jax.random.normal(kc, (1, B, hidden_dim), jnp.float32))

    mu, log_std, (h_out, c_out) = actor_forward(
        params, state, last_action, hidden_in, hidden_dim=hidden_dim)
    mu = jax.block_until_ready(mu)
    log_std = jax.block_until_ready(log_std)
    h_out = jax.block_until_ready(h_out)
    c_out = jax.block_until_ready(c_out)

    mu_r, ls_r, (h_r, c_r) = actor_forward_ref(
        params, state, last_action, hidden_in, hidden_dim)

    assert mu.shape == (B, T, action_dim)
    assert log_std.shape == (B, T, action_dim)
    assert h_out.shape == (1, B, hidden_dim) and c_out.shape == (1, B, hidden_dim)
    # bf16 operands / f32 accumulation on the bulk matmuls -> loosened tolerance.
    assert jnp.allclose(mu, mu_r, atol=5e-2, rtol=5e-2)
    assert jnp.allclose(log_std, ls_r, atol=5e-2, rtol=5e-2)
    assert jnp.allclose(h_out, h_r, atol=5e-2, rtol=5e-2)
    assert jnp.allclose(c_out, c_r, atol=5e-2, rtol=5e-2)

    print("KERNEL_OK")
</pallas_src>

<mosaic_0001>
module attributes {stable_mosaic.version = 11 : i64} {
  func.func @_actor_kernel(%arg0: memref<64x16xbf16, #tpu.memory_space<vmem>>, %arg1: memref<64x4xbf16, #tpu.memory_space<vmem>>, %arg2: memref<8x128xf32, #tpu.memory_space<vmem>>, %arg3: memref<8x128xf32, #tpu.memory_space<vmem>>, %arg4: memref<16x64xbf16, #tpu.memory_space<vmem>>, %arg5: memref<1x64xf32, #tpu.memory_space<vmem>>, %arg6: memref<4x32xbf16, #tpu.memory_space<vmem>>, %arg7: memref<32x128xbf16, #tpu.memory_space<vmem>>, %arg8: memref<32x128xf32, #tpu.memory_space<vmem>>, %arg9: memref<1x128xf32, #tpu.memory_space<vmem>>, %arg10: memref<32x32xbf16, #tpu.memory_space<vmem>>, %arg11: memref<128x32xbf16, #tpu.memory_space<vmem>>, %arg12: memref<1x32xf32, #tpu.memory_space<vmem>>, %arg13: memref<32x32xbf16, #tpu.memory_space<vmem>>, %arg14: memref<1x32xf32, #tpu.memory_space<vmem>>, %arg15: memref<32x8xbf16, #tpu.memory_space<vmem>>, %arg16: memref<1x8xf32, #tpu.memory_space<vmem>>, %arg17: memref<64x8xf32, #tpu.memory_space<vmem>>, %arg18: memref<8x128xf32, #tpu.memory_space<vmem>>, %arg19: memref<8x128xf32, #tpu.memory_space<vmem>>, %arg20: memref<64x128xf32, #tpu.memory_space<vmem>>, %arg21: memref<64x32xf32, #tpu.memory_space<vmem>>) attributes {dimension_semantics = [], scalar_prefetch = 0 : i64, scratch_operands = 2 : i64, tpu.core_type = #tpu.core_type<tc>} {
    %c0 = arith.constant 0 : index
    %c0_0 = arith.constant 0 : index
    %0 = vector.load %arg0[%c0, %c0_0] : memref<64x16xbf16, #tpu.memory_space<vmem>>, vector<64x16xbf16>
    %c0_1 = arith.constant 0 : index
    %c0_2 = arith.constant 0 : index
    %1 = vector.load %arg4[%c0_1, %c0_2] : memref<16x64xbf16, #tpu.memory_space<vmem>>, vector<16x64xbf16>
    %cst = arith.constant dense<0.000000e+00> : vector<64x64xf32>
    %2 = tpu.matmul %0, %1, %cst {dimension_numbers = #tpu.dot_dimension_numbers<[1], [0], [0], [1], [0, 0, 1, 1], [], []>} : vector<64x16xbf16>, vector<16x64xbf16>, vector<64x64xf32> -> vector<64x64xf32>
    %c0_3 = arith.constant 0 : index
    %c0_4 = arith.constant 0 : index
    %3 = vector.load %arg5[%c0_3, %c0_4] : memref<1x64xf32, #tpu.memory_space<vmem>>, vector<1x64xf32>
    %4 = vector.broadcast %3 : vector<1x64xf32> to vector<64x64xf32>
    %5 = arith.addf %2, %4 : vector<64x64xf32>
    %6 = vector.extract_strided_slice %5 {offsets = [0, 0], sizes = [64, 32], strides = [1, 1]} : vector<64x64xf32> to vector<64x32xf32>
    %cst_5 = arith.constant 0.000000e+00 : f32
    %7 = vector.broadcast %cst_5 : f32 to vector<64x32xf32>
    %8 = arith.maximumf %6, %7 : vector<64x32xf32>
    %9 = vector.extract_strided_slice %5 {offsets = [0, 32], sizes = [64, 32], strides = [1, 1]} : vector<64x64xf32> to vector<64x32xf32>
    %c0_6 = arith.constant 0 : index
    %c0_7 = arith.constant 0 : index
    %10 = vector.load %arg1[%c0_6, %c0_7] : memref<64x4xbf16, #tpu.memory_space<vmem>>, vector<64x4xbf16>
    %c0_8 = arith.constant 0 : index
    %c0_9 = arith.constant 0 : index
    %11 = vector.load %arg6[%c0_8, %c0_9] : memref<4x32xbf16, #tpu.memory_space<vmem>>, vector<4x32xbf16>
    %cst_10 = arith.constant dense<0.000000e+00> : vector<64x32xf32>
    %12 = tpu.matmul %10, %11, %cst_10 {dimension_numbers = #tpu.dot_dimension_numbers<[1], [0], [0], [1], [0, 0, 1, 1], [], []>} : vector<64x4xbf16>, vector<4x32xbf16>, vector<64x32xf32> -> vector<64x32xf32>
    %13 = arith.addf %9, %12 : vector<64x32xf32>
    %cst_11 = arith.constant 0.000000e+00 : f32
    %14 = vector.broadcast %cst_11 : f32 to vector<64x32xf32>
    %15 = arith.maximumf %13, %14 : vector<64x32xf32>
    %16 = arith.truncf %8 : vector<64x32xf32> to vector<64x32xbf16>
    %c0_12 = arith.constant 0 : index
    %c0_13 = arith.constant 0 : index
    %17 = vector.load %arg10[%c0_12, %c0_13] : memref<32x32xbf16, #tpu.memory_space<vmem>>, vector<32x32xbf16>
    %cst_14 = arith.constant dense<0.000000e+00> : vector<64x32xf32>
    %18 = tpu.matmul %16, %17, %cst_14 {dimension_numbers = #tpu.dot_dimension_numbers<[1], [0], [0], [1], [0, 0, 1, 1], [], []>} : vector<64x32xbf16>, vector<32x32xbf16>, vector<64x32xf32> -> vector<64x32xf32>
    %c0_15 = arith.constant 0 : index
    %c0_16 = arith.constant 0 : index
    %19 = vector.load %arg21[%c0_15, %c0_16] : memref<64x32xf32, #tpu.memory_space<vmem>>, vector<64x32xf32>
    tpu.vector_store %arg21[%c0_15, %c0_16], %18 {strides = array<i32>} : memref<64x32xf32, #tpu.memory_space<vmem>>, vector<64x32xf32>,
    %20 = arith.truncf %15 : vector<64x32xf32> to vector<64x32xbf16>
    %c0_17 = arith.constant 0 : index
    %c0_18 = arith.constant 0 : index
    %21 = vector.load %arg7[%c0_17, %c0_18] : memref<32x128xbf16, #tpu.memory_space<vmem>>, vector<32x128xbf16>
    %cst_19 = arith.constant dense<0.000000e+00> : vector<64x128xf32>
    %22 = tpu.matmul %20, %21, %cst_19 {dimension_numbers = #tpu.dot_dimension_numbers<[1], [0], [0], [1], [0, 0, 1, 1], [], []>} : vector<64x32xbf16>, vector<32x128xbf16>, vector<64x128xf32> -> vector<64x128xf32>
    %c0_20 = arith.constant 0 : index
    %c0_21 = arith.constant 0 : index
    %23 = vector.load %arg9[%c0_20, %c0_21] : memref<1x128xf32, #tpu.memory_space<vmem>>, vector<1x128xf32>
    %24 = vector.broadcast %23 : vector<1x128xf32> to vector<64x128xf32>
    %25 = arith.addf %22, %24 : vector<64x128xf32>
    %c0_22 = arith.constant 0 : index
    %c0_23 = arith.constant 0 : index
    %26 = vector.load %arg20[%c0_22, %c0_23] : memref<64x128xf32, #tpu.memory_space<vmem>>, vector<64x128xf32>
    tpu.vector_store %arg20[%c0_22, %c0_23], %25 {strides = array<i32>} : memref<64x128xf32, #tpu.memory_space<vmem>>, vector<64x128xf32>,
    %c0_24 = arith.constant 0 : index
    %c0_25 = arith.constant 0 : index
    %27 = vector.load %arg8[%c0_24, %c0_25] : memref<32x128xf32, #tpu.memory_space<vmem>>, vector<32x128xf32>
    %28 = tpu.iota {dimensions = array<i32: 1>} : vector<8x128xi32>
    %c64_i32 = arith.constant 64 : i32
    %29 = vector.broadcast %c64_i32 : i32 to vector<8x128xi32>
    %30 = arith.cmpi sge, %28, %29 : vector<8x128xi32>
    %c96_i32 = arith.constant 96 : i32
    %31 = vector.broadcast %c96_i32 : i32 to vector<8x128xi32>
    %32 = arith.cmpi slt, %28, %31 : vector<8x128xi32>
    %33 = arith.andi %30, %32 : vector<8x128xi1>
    %c0_26 = arith.constant 0 : index
    %c0_27 = arith.constant 0 : index
    %34 = vector.load %arg2[%c0_26, %c0_27] : memref<8x128xf32, #tpu.memory_space<vmem>>, vector<8x128xf32>
    %c0_28 = arith.constant 0 : index
    %c0_29 = arith.constant 0 : index
    %35 = vector.load %arg3[%c0_28, %c0_29] : memref<8x128xf32, #tpu.memory_space<vmem>>, vector<8x128xf32>
    %c0_i32 = arith.constant 0 : i32
    %c8_i32 = arith.constant 8 : i32
    %36 = arith.muli %c0_i32, %c8_i32 : i32
    %37 = tpu.assume_multiple %36, 8 : i32
    %38 = arith.index_cast %37 : i32 to index
    %c0_30 = arith.constant 0 : index
    %39 = vector.load %arg20[%38, %c0_30] : memref<64x128xf32, #tpu.memory_space<vmem>>, vector<8x128xf32>
    %40 = vector.extract_strided_slice %34 {offsets = [0, 0], sizes = [8, 32], strides = [1, 1]} : vector<8x128xf32> to vector<8x32xf32>
    %cst_31 = arith.constant dense<0.000000e+00> : vector<8x128xf32>
    %41 = tpu.matmul %40, %27, %cst_31 {dimension_numbers = #tpu.dot_dimension_numbers<[1], [0], [0], [1], [0, 0, 1, 1], [], []>} : vector<8x32xf32>, vector<32x128xf32>, vector<8x128xf32> -> vector<8x128xf32>
    %42 = arith.addf %39, %41 : vector<8x128xf32>
    %43 = math.tanh %42 : vector<8x128xf32>
    %44 = arith.negf %42 : vector<8x128xf32>
    %45 = math.exp %44 : vector<8x128xf32>
    %cst_32 = arith.constant 1.000000e+00 : f32
    %46 = vector.broadcast %cst_32 : f32 to vector<8x128xf32>
    %47 = arith.addf %46, %45 : vector<8x128xf32>
    %48 = arith.divf %46, %47 : vector<8x128xf32>
    %49 = arith.select %33, %43, %48 : vector<8x128xi1>, vector<8x128xf32>
    %c96_i32_33 = arith.constant 96 : i32
    %50 = tpu.dynamic_rotate %49 by %c96_i32_33 dim 1 : vector<8x128xf32>, i32 -> vector<8x128xf32>
    %c64_i32_34 = arith.constant 64 : i32
    %51 = tpu.dynamic_rotate %49 by %c64_i32_34 dim 1 : vector<8x128xf32>, i32 -> vector<8x128xf32>
    %c32_i32 = arith.constant 32 : i32
    %52 = tpu.dynamic_rotate %49 by %c32_i32 dim 1 : vector<8x128xf32>, i32 -> vector<8x128xf32>
    %53 = arith.mulf %50, %35 : vector<8x128xf32>
    %54 = arith.mulf %49, %51 : vector<8x128xf32>
    %55 = arith.addf %53, %54 : vector<8x128xf32>
    %56 = math.tanh %55 : vector<8x128xf32>
    %57 = arith.mulf %52, %56 : vector<8x128xf32>
    %58 = arith.index_cast %37 : i32 to index
    %c0_35 = arith.constant 0 : index
    %59 = vector.load %arg20[%58, %c0_35] : memref<64x128xf32, #tpu.memory_space<vmem>>, vector<8x128xf32>
    tpu.vector_store %arg20[%58, %c0_35], %57 {strides = array<i32>} : memref<64x128xf32, #tpu.memory_space<vmem>>, vector<8x128xf32>,
    %c1_i32 = arith.constant 1 : i32
    %c8_i32_36 = arith.constant 8 : i32
    %60 = arith.muli %c1_i32, %c8_i32_36 : i32
    %61 = tpu.assume_multiple %60, 8 : i32
    %62 = arith.index_cast %61 : i32 to index
    %c0_37 = arith.constant 0 : index
    %63 = vector.load %arg20[%62, %c0_37] : memref<64x128xf32, #tpu.memory_space<vmem>>, vector<8x128xf32>
    %64 = vector.extract_strided_slice %57 {offsets = [0, 0], sizes = [8, 32], strides = [1, 1]} : vector<8x128xf32> to vector<8x32xf32>
    %cst_38 = arith.constant dense<0.000000e+00> : vector<8x128xf32>
    %65 = tpu.matmul %64, %27, %cst_38 {dimension_numbers = #tpu.dot_dimension_numbers<[1], [0], [0], [1], [0, 0, 1, 1], [], []>} : vector<8x32xf32>, vector<32x128xf32>, vector<8x128xf32> -> vector<8x128xf32>
    %66 = arith.addf %63, %65 : vector<8x128xf32>
    %67 = math.tanh %66 : vector<8x128xf32>
    %68 = arith.negf %66 : vector<8x128xf32>
    %69 = math.exp %68 : vector<8x128xf32>
    %cst_39 = arith.constant 1.000000e+00 : f32
    %70 = vector.broadcast %cst_39 : f32 to vector<8x128xf32>
    %71 = arith.addf %70, %69 : vector<8x128xf32>
    %72 = arith.divf %70, %71 : vector<8x128xf32>
    %73 = arith.select %33, %67, %72 : vector<8x128xi1>, vector<8x128xf32>
    %c96_i32_40 = arith.constant 96 : i32
    %74 = tpu.dynamic_rotate %73 by %c96_i32_40 dim 1 : vector<8x128xf32>, i32 -> vector<8x128xf32>
    %c64_i32_41 = arith.constant 64 : i32
    %75 = tpu.dynamic_rotate %73 by %c64_i32_41 dim 1 : vector<8x128xf32>, i32 -> vector<8x128xf32>
    %c32_i32_42 = arith.constant 32 : i32
    %76 = tpu.dynamic_rotate %73 by %c32_i32_42 dim 1 : vector<8x128xf32>, i32 -> vector<8x128xf32>
    %77 = arith.mulf %74, %55 : vector<8x128xf32>
    %78 = arith.mulf %73, %75 : vector<8x128xf32>
    %79 = arith.addf %77, %78 : vector<8x128xf32>
    %80 = math.tanh %79 : vector<8x128xf32>
    %81 = arith.mulf %76, %80 : vector<8x128xf32>
    %82 = arith.index_cast %61 : i32 to index
    %c0_43 = arith.constant 0 : index
    %83 = vector.load %arg20[%82, %c0_43] : memref<64x128xf32, #tpu.memory_space<vmem>>, vector<8x128xf32>
    tpu.vector_store %arg20[%82, %c0_43], %81 {strides = array<i32>} : memref<64x128xf32, #tpu.memory_space<vmem>>, vector<8x128xf32>,
    %c2_i32 = arith.constant 2 : i32
    %c8_i32_44 = arith.constant 8 : i32
    %84 = arith.muli %c2_i32, %c8_i32_44 : i32
    %85 = tpu.assume_multiple %84, 8 : i32
    %86 = arith.index_cast %85 : i32 to index
    %c0_45 = arith.constant 0 : index
    %87 = vector.load %arg20[%86, %c0_45] : memref<64x128xf32, #tpu.memory_space<vmem>>, vector<8x128xf32>
    %88 = vector.extract_strided_slice %81 {offsets = [0, 0], sizes = [8, 32], strides = [1, 1]} : vector<8x128xf32> to vector<8x32xf32>
    %cst_46 = arith.constant dense<0.000000e+00> : vector<8x128xf32>
    %89 = tpu.matmul %88, %27, %cst_46 {dimension_numbers = #tpu.dot_dimension_numbers<[1], [0], [0], [1], [0, 0, 1, 1], [], []>} : vector<8x32xf32>, vector<32x128xf32>, vector<8x128xf32> -> vector<8x128xf32>
    %90 = arith.addf %87, %89 : vector<8x128xf32>
    %91 = math.tanh %90 : vector<8x128xf32>
    %92 = arith.negf %90 : vector<8x128xf32>
    %93 = math.exp %92 : vector<8x128xf32>
    %cst_47 = arith.constant 1.000000e+00 : f32
    %94 = vector.broadcast %cst_47 : f32 to vector<8x128xf32>
    %95 = arith.addf %94, %93 : vector<8x128xf32>
    %96 = arith.divf %94, %95 : vector<8x128xf32>
    %97 = arith.select %33, %91, %96 : vector<8x128xi1>, vector<8x128xf32>
    %c96_i32_48 = arith.constant 96 : i32
    %98 = tpu.dynamic_rotate %97 by %c96_i32_48 dim 1 : vector<8x128xf32>, i32 -> vector<8x128xf32>
    %c64_i32_49 = arith.constant 64 : i32
    %99 = tpu.dynamic_rotate %97 by %c64_i32_49 dim 1 : vector<8x128xf32>, i32 -> vector<8x128xf32>
    %c32_i32_50 = arith.constant 32 : i32
    %100 = tpu.dynamic_rotate %97 by %c32_i32_50 dim 1 : vector<8x128xf32>, i32 -> vector<8x128xf32>
    %101 = arith.mulf %98, %79 : vector<8x128xf32>
    %102 = arith.mulf %97, %99 : vector<8x128xf32>
    %103 = arith.addf %101, %102 : vector<8x128xf32>
    %104 = math.tanh %103 : vector<8x128xf32>
    %105 = arith.mulf %100, %104 : vector<8x128xf32>
    %106 = arith.index_cast %85 : i32 to index
    %c0_51 = arith.constant 0 : index
    %107 = vector.load %arg20[%106, %c0_51] : memref<64x128xf32, #tpu.memory_space<vmem>>, vector<8x128xf32>
    tpu.vector_store %arg20[%106, %c0_51], %105 {strides = array<i32>} : memref<64x128xf32, #tpu.memory_space<vmem>>, vector<8x128xf32>,
    %c3_i32 = arith.constant 3 : i32
    %c8_i32_52 = arith.constant 8 : i32
    %108 = arith.muli %c3_i32, %c8_i32_52 : i32
    %109 = tpu.assume_multiple %108, 8 : i32
    %110 = arith.index_cast %109 : i32 to index
    %c0_53 = arith.constant 0 : index
    %111 = vector.load %arg20[%110, %c0_53] : memref<64x128xf32, #tpu.memory_space<vmem>>, vector<8x128xf32>
    %112 = vector.extract_strided_slice %105 {offsets = [0, 0], sizes = [8, 32], strides = [1, 1]} : vector<8x128xf32> to vector<8x32xf32>
    %cst_54 = arith.constant dense<0.000000e+00> : vector<8x128xf32>
    %113 = tpu.matmul %112, %27, %cst_54 {dimension_numbers = #tpu.dot_dimension_numbers<[1], [0], [0], [1], [0, 0, 1, 1], [], []>} : vector<8x32xf32>, vector<32x128xf32>, vector<8x128xf32> -> vector<8x128xf32>
    %114 = arith.addf %111, %113 : vector<8x128xf32>
    %115 = math.tanh %114 : vector<8x128xf32>
    %116 = arith.negf %114 : vector<8x128xf32>
    %117 = math.exp %116 : vector<8x128xf32>
    %cst_55 = arith.constant 1.000000e+00 : f32
    %118 = vector.broadcast %cst_55 : f32 to vector<8x128xf32>
    %119 = arith.addf %118, %117 : vector<8x128xf32>
    %120 = arith.divf %118, %119 : vector<8x128xf32>
    %121 = arith.select %33, %115, %120 : vector<8x128xi1>, vector<8x128xf32>
    %c96_i32_56 = arith.constant 96 : i32
    %122 = tpu.dynamic_rotate %121 by %c96_i32_56 dim 1 : vector<8x128xf32>, i32 -> vector<8x128xf32>
    %c64_i32_57 = arith.constant 64 : i32
    %123 = tpu.dynamic_rotate %121 by %c64_i32_57 dim 1 : vector<8x128xf32>, i32 -> vector<8x128xf32>
    %c32_i32_58 = arith.constant 32 : i32
    %124 = tpu.dynamic_rotate %121 by %c32_i32_58 dim 1 : vector<8x128xf32>, i32 -> vector<8x128xf32>
    %125 = arith.mulf %122, %103 : vector<8x128xf32>
    %126 = arith.mulf %121, %123 : vector<8x128xf32>
    %127 = arith.addf %125, %126 : vector<8x128xf32>
    %128 = math.tanh %127 : vector<8x128xf32>
    %129 = arith.mulf %124, %128 : vector<8x128xf32>
    %130 = arith.index_cast %109 : i32 to index
    %c0_59 = arith.constant 0 : index
    %131 = vector.load %arg20[%130, %c0_59] : memref<64x128xf32, #tpu.memory_space<vmem>>, vector<8x128xf32>
    tpu.vector_store %arg20[%130, %c0_59], %129 {strides = array<i32>} : memref<64x128xf32, #tpu.memory_space<vmem>>, vector<8x128xf32>,
    %c4_i32 = arith.constant 4 : i32
    %c8_i32_60 = arith.constant 8 : i32
    %132 = arith.muli %c4_i32, %c8_i32_60 : i32
    %133 = tpu.assume_multiple %132, 8 : i32
    %134 = arith.index_cast %133 : i32 to index
    %c0_61 = arith.constant 0 : index
    %135 = vector.load %arg20[%134, %c0_61] : memref<64x128xf32, #tpu.memory_space<vmem>>, vector<8x128xf32>
    %136 = vector.extract_strided_slice %129 {offsets = [0, 0], sizes = [8, 32], strides = [1, 1]} : vector<8x128xf32> to vector<8x32xf32>
    %cst_62 = arith.constant dense<0.000000e+00> : vector<8x128xf32>
    %137 = tpu.matmul %136, %27, %cst_62 {dimension_numbers = #tpu.dot_dimension_numbers<[1], [0], [0], [1], [0, 0, 1, 1], [], []>} : vector<8x32xf32>, vector<32x128xf32>, vector<8x128xf32> -> vector<8x128xf32>
    %138 = arith.addf %135, %137 : vector<8x128xf32>
    %139 = math.tanh %138 : vector<8x128xf32>
    %140 = arith.negf %138 : vector<8x128xf32>
    %141 = math.exp %140 : vector<8x128xf32>
    %cst_63 = arith.constant 1.000000e+00 : f32
    %142 = vector.broadcast %cst_63 : f32 to vector<8x128xf32>
    %143 = arith.addf %142, %141 : vector<8x128xf32>
    %144 = arith.divf %142, %143 : vector<8x128xf32>
    %145 = arith.select %33, %139, %144 : vector<8x128xi1>, vector<8x128xf32>
    %c96_i32_64 = arith.constant 96 : i32
    %146 = tpu.dynamic_rotate %145 by %c96_i32_64 dim 1 : vector<8x128xf32>, i32 -> vector<8x128xf32>
    %c64_i32_65 = arith.constant 64 : i32
    %147 = tpu.dynamic_rotate %145 by %c64_i32_65 dim 1 : vector<8x128xf32>, i32 -> vector<8x128xf32>
    %c32_i32_66 = arith.constant 32 : i32
    %148 = tpu.dynamic_rotate %145 by %c32_i32_66 dim 1 : vector<8x128xf32>, i32 -> vector<8x128xf32>
    %149 = arith.mulf %146, %127 : vector<8x128xf32>
    %150 = arith.mulf %145, %147 : vector<8x128xf32>
    %151 = arith.addf %149, %150 : vector<8x128xf32>
    %152 = math.tanh %151 : vector<8x128xf32>
    %153 = arith.mulf %148, %152 : vector<8x128xf32>
    %154 = arith.index_cast %133 : i32 to index
    %c0_67 = arith.constant 0 : index
    %155 = vector.load %arg20[%154, %c0_67] : memref<64x128xf32, #tpu.memory_space<vmem>>, vector<8x128xf32>
    tpu.vector_store %arg20[%154, %c0_67], %153 {strides = array<i32>} : memref<64x128xf32, #tpu.memory_space<vmem>>, vector<8x128xf32>,
    %c5_i32 = arith.constant 5 : i32
    %c8_i32_68 = arith.constant 8 : i32
    %156 = arith.muli %c5_i32, %c8_i32_68 : i32
    %157 = tpu.assume_multiple %156, 8 : i32
    %158 = arith.index_cast %157 : i32 to index
    %c0_69 = arith.constant 0 : index
    %159 = vector.load %arg20[%158, %c0_69] : memref<64x128xf32, #tpu.memory_space<vmem>>, vector<8x128xf32>
    %160 = vector.extract_strided_slice %153 {offsets = [0, 0], sizes = [8, 32], strides = [1, 1]} : vector<8x128xf32> to vector<8x32xf32>
    %cst_70 = arith.constant dense<0.000000e+00> : vector<8x128xf32>
    %161 = tpu.matmul %160, %27, %cst_70 {dimension_numbers = #tpu.dot_dimension_numbers<[1], [0], [0], [1], [0, 0, 1, 1], [], []>} : vector<8x32xf32>, vector<32x128xf32>, vector<8x128xf32> -> vector<8x128xf32>
    %162 = arith.addf %159, %161 : vector<8x128xf32>
    %163 = math.tanh %162 : vector<8x128xf32>
    %164 = arith.negf %162 : vector<8x128xf32>
    %165 = math.exp %164 : vector<8x128xf32>
    %cst_71 = arith.constant 1.000000e+00 : f32
    %166 = vector.broadcast %cst_71 : f32 to vector<8x128xf32>
    %167 = arith.addf %166, %165 : vector<8x128xf32>
    %168 = arith.divf %166, %167 : vector<8x128xf32>
    %169 = arith.select %33, %163, %168 : vector<8x128xi1>, vector<8x128xf32>
    %c96_i32_72 = arith.constant 96 : i32
    %170 = tpu.dynamic_rotate %169 by %c96_i32_72 dim 1 : vector<8x128xf32>, i32 -> vector<8x128xf32>
    %c64_i32_73 = arith.constant 64 : i32
    %171 = tpu.dynamic_rotate %169 by %c64_i32_73 dim 1 : vector<8x128xf32>, i32 -> vector<8x128xf32>
    %c32_i32_74 = arith.constant 32 : i32
    %172 = tpu.dynamic_rotate %169 by %c32_i32_74 dim 1 : vector<8x128xf32>, i32 -> vector<8x128xf32>
    %173 = arith.mulf %170, %151 : vector<8x128xf32>
    %174 = arith.mulf %169, %171 : vector<8x128xf32>
    %175 = arith.addf %173, %174 : vector<8x128xf32>
    %176 = math.tanh %175 : vector<8x128xf32>
    %177 = arith.mulf %172, %176 : vector<8x128xf32>
    %178 = arith.index_cast %157 : i32 to index
    %c0_75 = arith.constant 0 : index
    %179 = vector.load %arg20[%178, %c0_75] : memref<64x128xf32, #tpu.memory_space<vmem>>, vector<8x128xf32>
    tpu.vector_store %arg20[%178, %c0_75], %177 {strides = array<i32>} : memref<64x128xf32, #tpu.memory_space<vmem>>, vector<8x128xf32>,
    %c6_i32 = arith.constant 6 : i32
    %c8_i32_76 = arith.constant 8 : i32
    %180 = arith.muli %c6_i32, %c8_i32_76 : i32
    %181 = tpu.assume_multiple %180, 8 : i32
    %182 = arith.index_cast %181 : i32 to index
    %c0_77 = arith.constant 0 : index
    %183 = vector.load %arg20[%182, %c0_77] : memref<64x128xf32, #tpu.memory_space<vmem>>, vector<8x128xf32>
    %184 = vector.extract_strided_slice %177 {offsets = [0, 0], sizes = [8, 32], strides = [1, 1]} : vector<8x128xf32> to vector<8x32xf32>
    %cst_78 = arith.constant dense<0.000000e+00> : vector<8x128xf32>
    %185 = tpu.matmul %184, %27, %cst_78 {dimension_numbers = #tpu.dot_dimension_numbers<[1], [0], [0], [1], [0, 0, 1, 1], [], []>} : vector<8x32xf32>, vector<32x128xf32>, vector<8x128xf32> -> vector<8x128xf32>
    %186 = arith.addf %183, %185 : vector<8x128xf32>
    %187 = math.tanh %186 : vector<8x128xf32>
    %188 = arith.negf %186 : vector<8x128xf32>
    %189 = math.exp %188 : vector<8x128xf32>
    %cst_79 = arith.constant 1.000000e+00 : f32
    %190 = vector.broadcast %cst_79 : f32 to vector<8x128xf32>
    %191 = arith.addf %190, %189 : vector<8x128xf32>
    %192 = arith.divf %190, %191 : vector<8x128xf32>
    %193 = arith.select %33, %187, %192 : vector<8x128xi1>, vector<8x128xf32>
    %c96_i32_80 = arith.constant 96 : i32
    %194 = tpu.dynamic_rotate %193 by %c96_i32_80 dim 1 : vector<8x128xf32>, i32 -> vector<8x128xf32>
    %c64_i32_81 = arith.constant 64 : i32
    %195 = tpu.dynamic_rotate %193 by %c64_i32_81 dim 1 : vector<8x128xf32>, i32 -> vector<8x128xf32>
    %c32_i32_82 = arith.constant 32 : i32
    %196 = tpu.dynamic_rotate %193 by %c32_i32_82 dim 1 : vector<8x128xf32>, i32 -> vector<8x128xf32>
    %197 = arith.mulf %194, %175 : vector<8x128xf32>
    %198 = arith.mulf %193, %195 : vector<8x128xf32>
    %199 = arith.addf %197, %198 : vector<8x128xf32>
    %200 = math.tanh %199 : vector<8x128xf32>
    %201 = arith.mulf %196, %200 : vector<8x128xf32>
    %202 = arith.index_cast %181 : i32 to index
    %c0_83 = arith.constant 0 : index
    %203 = vector.load %arg20[%202, %c0_83] : memref<64x128xf32, #tpu.memory_space<vmem>>, vector<8x128xf32>
    tpu.vector_store %arg20[%202, %c0_83], %201 {strides = array<i32>} : memref<64x128xf32, #tpu.memory_space<vmem>>, vector<8x128xf32>,
    %c7_i32 = arith.constant 7 : i32
    %c8_i32_84 = arith.constant 8 : i32
    %204 = arith.muli %c7_i32, %c8_i32_84 : i32
    %205 = tpu.assume_multiple %204, 8 : i32
    %206 = arith.index_cast %205 : i32 to index
    %c0_85 = arith.constant 0 : index
    %207 = vector.load %arg20[%206, %c0_85] : memref<64x128xf32, #tpu.memory_space<vmem>>, vector<8x128xf32>
    %208 = vector.extract_strided_slice %201 {offsets = [0, 0], sizes = [8, 32], strides = [1, 1]} : vector<8x128xf32> to vector<8x32xf32>
    %cst_86 = arith.constant dense<0.000000e+00> : vector<8x128xf32>
    %209 = tpu.matmul %208, %27, %cst_86 {dimension_numbers = #tpu.dot_dimension_numbers<[1], [0], [0], [1], [0, 0, 1, 1], [], []>} : vector<8x32xf32>, vector<32x128xf32>, vector<8x128xf32> -> vector<8x128xf32>
    %210 = arith.addf %207, %209 : vector<8x128xf32>
    %211 = math.tanh %210 : vector<8x128xf32>
    %212 = arith.negf %210 : vector<8x128xf32>
    %213 = math.exp %212 : vector<8x128xf32>
    %cst_87 = arith.constant 1.000000e+00 : f32
    %214 = vector.broadcast %cst_87 : f32 to vector<8x128xf32>
    %215 = arith.addf %214, %213 : vector<8x128xf32>
    %216 = arith.divf %214, %215 : vector<8x128xf32>
    %217 = arith.select %33, %211, %216 : vector<8x128xi1>, vector<8x128xf32>
    %c96_i32_88 = arith.constant 96 : i32
    %218 = tpu.dynamic_rotate %217 by %c96_i32_88 dim 1 : vector<8x128xf32>, i32 -> vector<8x128xf32>
    %c64_i32_89 = arith.constant 64 : i32
    %219 = tpu.dynamic_rotate %217 by %c64_i32_89 dim 1 : vector<8x128xf32>, i32 -> vector<8x128xf32>
    %c32_i32_90 = arith.constant 32 : i32
    %220 = tpu.dynamic_rotate %217 by %c32_i32_90 dim 1 : vector<8x128xf32>, i32 -> vector<8x128xf32>
    %221 = arith.mulf %218, %199 : vector<8x128xf32>
    %222 = arith.mulf %217, %219 : vector<8x128xf32>
    %223 = arith.addf %221, %222 : vector<8x128xf32>
    %224 = math.tanh %223 : vector<8x128xf32>
    %225 = arith.mulf %220, %224 : vector<8x128xf32>
    %226 = arith.index_cast %205 : i32 to index
    %c0_91 = arith.constant 0 : index
    %227 = vector.load %arg20[%226, %c0_91] : memref<64x128xf32, #tpu.memory_space<vmem>>, vector<8x128xf32>
    tpu.vector_store %arg20[%226, %c0_91], %225 {strides = array<i32>} : memref<64x128xf32, #tpu.memory_space<vmem>>, vector<8x128xf32>,
    %c8_i32_92 = arith.constant 8 : i32
    %c0_93 = arith.constant 0 : index
    %c0_94 = arith.constant 0 : index
    %228 = vector.load %arg18[%c0_93, %c0_94] : memref<8x128xf32, #tpu.memory_space<vmem>>, vector<8x128xf32>
    tpu.vector_store %arg18[%c0_93, %c0_94], %225 {strides = array<i32>} : memref<8x128xf32, #tpu.memory_space<vmem>>, vector<8x128xf32>,
    %c0_95 = arith.constant 0 : index
    %c0_96 = arith.constant 0 : index
    %229 = vector.load %arg19[%c0_95, %c0_96] : memref<8x128xf32, #tpu.memory_space<vmem>>, vector<8x128xf32>
    tpu.vector_store %arg19[%c0_95, %c0_96], %223 {strides = array<i32>} : memref<8x128xf32, #tpu.memory_space<vmem>>, vector<8x128xf32>,
    %c0_97 = arith.constant 0 : index
    %c0_98 = arith.constant 0 : index
    %230 = vector.load %arg20[%c0_97, %c0_98] : memref<64x128xf32, #tpu.memory_space<vmem>>, vector<64x128xf32>
    %231 = arith.truncf %230 : vector<64x128xf32> to vector<64x128xbf16>
    %c0_99 = arith.constant 0 : index
    %c0_100 = arith.constant 0 : index
    %232 = vector.load %arg21[%c0_99, %c0_100] : memref<64x32xf32, #tpu.memory_space<vmem>>, vector<64x32xf32>
    %c0_101 = arith.constant 0 : index
    %c0_102 = arith.constant 0 : index
    %233 = vector.load %arg11[%c0_101, %c0_102] : memref<128x32xbf16, #tpu.memory_space<vmem>>, vector<128x32xbf16>
    %cst_103 = arith.constant dense<0.000000e+00> : vector<64x32xf32>
    %234 = tpu.matmul %231, %233, %cst_103 {dimension_numbers = #tpu.dot_dimension_numbers<[1], [0], [0], [1], [0, 0, 1, 1], [], []>} : vector<64x128xbf16>, vector<128x32xbf16>, vector<64x32xf32> -> vector<64x32xf32>
    %235 = arith.addf %232, %234 : vector<64x32xf32>
    %c0_104 = arith.constant 0 : index
    %c0_105 = arith.constant 0 : index
    %236 = vector.load %arg12[%c0_104, %c0_105] : memref<1x32xf32, #tpu.memory_space<vmem>>, vector<1x32xf32>
    %237 = vector.broadcast %236 : vector<1x32xf32> to vector<64x32xf32>
    %238 = arith.addf %235, %237 : vector<64x32xf32>
    %cst_106 = arith.constant 0.000000e+00 : f32
    %239 = vector.broadcast %cst_106 : f32 to vector<64x32xf32>
    %240 = arith.maximumf %238, %239 : vector<64x32xf32>
    %241 = arith.truncf %240 : vector<64x32xf32> to vector<64x32xbf16>
    %c0_107 = arith.constant 0 : index
    %c0_108 = arith.constant 0 : index
    %242 = vector.load %arg13[%c0_107, %c0_108] : memref<32x32xbf16, #tpu.memory_space<vmem>>, vector<32x32xbf16>
    %cst_109 = arith.constant dense<0.000000e+00> : vector<64x32xf32>
    %243 = tpu.matmul %241, %242, %cst_109 {dimension_numbers = #tpu.dot_dimension_numbers<[1], [0], [0], [1], [0, 0, 1, 1], [], []>} : vector<64x32xbf16>, vector<32x32xbf16>, vector<64x32xf32> -> vector<64x32xf32>
    %c0_110 = arith.constant 0 : index
    %c0_111 = arith.constant 0 : index
    %244 = vector.load %arg14[%c0_110, %c0_111] : memref<1x32xf32, #tpu.memory_space<vmem>>, vector<1x32xf32>
    %245 = vector.broadcast %244 : vector<1x32xf32> to vector<64x32xf32>
    %246 = arith.addf %243, %245 : vector<64x32xf32>
    %cst_112 = arith.constant 0.000000e+00 : f32
    %247 = vector.broadcast %cst_112 : f32 to vector<64x32xf32>
    %248 = arith.maximumf %246, %247 : vector<64x32xf32>
    %249 = arith.truncf %248 : vector<64x32xf32> to vector<64x32xbf16>
    %c0_113 = arith.constant 0 : index
    %c0_114 = arith.constant 0 : index
    %250 = vector.load %arg15[%c0_113, %c0_114] : memref<32x8xbf16, #tpu.memory_space<vmem>>, vector<32x8xbf16>
    %cst_115 = arith.constant dense<0.000000e+00> : vector<64x8xf32>
    %251 = tpu.matmul %249, %250, %cst_115 {dimension_numbers = #tpu.dot_dimension_numbers<[1], [0], [0], [1], [0, 0, 1, 1], [], []>} : vector<64x32xbf16>, vector<32x8xbf16>, vector<64x8xf32> -> vector<64x8xf32>
    %c0_116 = arith.constant 0 : index
    %c0_117 = arith.constant 0 : index
    %252 = vector.load %arg16[%c0_116, %c0_117] : memref<1x8xf32, #tpu.memory_space<vmem>>, vector<1x8xf32>
    %253 = vector.broadcast %252 : vector<1x8xf32> to vector<64x8xf32>
    %254 = arith.addf %251, %253 : vector<64x8xf32>
    %255 = tpu.iota {dimensions = array<i32: 1>} : vector<64x8xi32>
    %cst_118 = arith.constant 0.000000e+00 : f32
    %256 = vector.broadcast %cst_118 : f32 to vector<64x8xf32>
    %257 = arith.maximumf %254, %256 : vector<64x8xf32>
    %cst_119 = arith.constant -2.000000e+01 : f32
    %cst_120 = arith.constant 2.000000e+00 : f32
    %258 = vector.broadcast %cst_119 : f32 to vector<64x8xf32>
    %259 = arith.maximumf %258, %257 : vector<64x8xf32>
    %260 = vector.broadcast %cst_120 : f32 to vector<64x8xf32>
    %261 = arith.minimumf %260, %259 : vector<64x8xf32>
    %c4_i32_121 = arith.constant 4 : i32
    %262 = vector.broadcast %c4_i32_121 : i32 to vector<64x8xi32>
    %263 = arith.cmpi slt, %255, %262 : vector<64x8xi32>
    %264 = arith.select %263, %254, %261 : vector<64x8xi1>, vector<64x8xf32>
    %c0_122 = arith.constant 0 : index
    %c0_123 = arith.constant 0 : index
    %265 = vector.load %arg17[%c0_122, %c0_123] : memref<64x8xf32, #tpu.memory_space<vmem>>, vector<64x8xf32>
    tpu.vector_store %arg17[%c0_122, %c0_123], %264 {strides = array<i32>} : memref<64x8xf32, #tpu.memory_space<vmem>>, vector<64x8xf32>,
    return
  }
}

</mosaic_0001>

<bundles_post_ra>
// kernel: actor_forward.1
= control target key start
LH: loop header
LB: loop body
LE: loop exit
PB: predicated region body
PF: predicated region fallthrough
CT: control target
= control target key end

     0   :  { %vm231_vm0 = vcmask 1041408   ;;  %vm218_vm1 = vcmask 31744   ;;  %vm103_vm2 = vcmask 130048   ;;  %v2240_v25 = vmov 0.0   ;;  %s2776_s6 = inlined_call_operand.vmem [shape: bf16[4,32], index: 6, kind: input, shape index: {}]   ;;  %s2777_s1 = inlined_call_operand.vmem [shape: bf16[64,4], index: 1, kind: input, shape index: {}]   ;;  %s2778_s4 = inlined_call_operand.vmem [shape: bf16[16,64], index: 4, kind: input, shape index: {}]   ;;  %s2779_s0 = inlined_call_operand.vmem [shape: bf16[64,16], index: 0, kind: input, shape index: {}]   ;;  %s2780_s10 = inlined_call_operand.vmem [shape: bf16[32,32], index: 10, kind: input, shape index: {}]   ;;  %s2781_s5 = inlined_call_operand.vmem [shape: f32[1,64], index: 5, kind: input, shape index: {}]   ;;  %s2782_s7 = inlined_call_operand.vmem [shape: bf16[32,128], index: 7, kind: input, shape index: {}]   ;;  %s2783_s8 = inlined_call_operand.vmem [shape: f32[32,128], index: 8, kind: input, shape index: {}]   ;;  %s2784_s2 = inlined_call_operand.vmem [shape: f32[8,128], index: 2, kind: input, shape index: {}]   ;;  %s2785_s9 = inlined_call_operand.vmem [shape: f32[1,128], index: 9, kind: input, shape index: {}]   ;;  %s2786_s3 = inlined_call_operand.vmem [shape: f32[8,128], index: 3, kind: input, shape index: {}]   ;;  %s2787_s11 = inlined_call_operand.vmem [shape: bf16[128,32], index: 11, kind: input, shape index: {}]   ;;  %s2788_s13 = inlined_call_operand.vmem [shape: bf16[32,32], index: 13, kind: input, shape index: {}]   ;;  %s2789_s12 = inlined_call_operand.vmem [shape: f32[1,32], index: 12, kind: input, shape index: {}]   ;;  %s2790_s19 = inlined_call_operand.vmem [shape: f32[8,128], index: 19, kind: output, shape index: {2}]   ;;  %s2791_s18 = inlined_call_operand.vmem [shape: f32[8,128], index: 18, kind: output, shape index: {1}]   ;;  %s2792_s15 = inlined_call_operand.vmem [shape: bf16[32,8], index: 15, kind: input, shape index: {}]   ;;  %s2793_s14 = inlined_call_operand.vmem [shape: f32[1,32], index: 14, kind: input, shape index: {}]   ;;  %s2794_s16 = inlined_call_operand.vmem [shape: f32[1,8], index: 16, kind: input, shape index: {}]   ;;  %s2795_s17 = inlined_call_operand.vmem [shape: f32[64,8], index: 17, kind: output, shape index: {0}]  }
   0x1   :  { %2798 = sst [smem:[#allocation4_spill]] %s2776_s6  ;;  %v2159_v11 = vld [vmem:[%s2780_s10 + $0x8] sm:$0xff]   ;;  %v2160_v12 = vld [vmem:[%s2780_s10] sm:$0xff]   ;;  %vm368_vm3 = vcmask 261120   ;;  %v2407_v35 = vld [vmem:[%s2783_s8 + $0x18] sm:$0xff]  ;;  %vm2241_vm4 = vmmov 0  }
   0x2   :  { %2799 = sst [smem:[#allocation5_spill]] %s2777_s1  ;;  %v1808_v15 = vld [vmem:[%s2781_s5] ss:$0 sm:$0xff]  ;;  %v2161_v24 = vld [vmem:[%s2782_s7 + $0x8] sm:$0xff]   ;;  %v2415_v36 = vld [vmem:[%s2783_s8 + $0x10] sm:$0xff]  ;;  %vm1787_vm9 = vcmask 64512  }
   0x3   :  { %2800 = sst [smem:[#allocation6_spill]] %s2778_s4  ;;  %v2162_v31 = vld [vmem:[%s2782_s7] sm:$0xff]   ;;  %v2438_v51 = vld [vmem:[%s2783_s8 + $0x8] sm:$0xff] }
   0x4   :  { %2801 = sst [smem:[#allocation7_spill]] %s2779_s0  ;;  %v2445_v54 = vld [vmem:[%s2783_s8] sm:$0xff] }
   0x5   :  { %s2802_s20 = sld [smem:[#allocation4_spill]]  ;;  %v587_v56 = vld [vmem:[%s2784_s2] sm:$0xff]  ;;  %s2242_s2 = smov 96  }
   0x6   :  { %s2803_s22 = sld [smem:[#allocation5_spill]] }
   0x7   :  { %s2804_s0 = sld [smem:[#allocation6_spill]] }
   0x8   :  { %s2805_s28 = sld [smem:[#allocation7_spill]] }
   0xb   :  { %v197_v0 = vld [vmem:[%s2802_s20] sm:$0x3] }
   0xc   :  { %2144 = vmatprep.subr.msk.bf16.mxu1 %vm231_vm0, %v197_v0  ;;  %v233_v1 = vsel %vm231_vm0, %v197_v0, 0  ;;  %v2150_v2 = vld [vmem:[%s2803_s22] sm:$0xff]   ;;  %v2151_v3 = vld [vmem:[%s2803_s22 + $0x8] sm:$0xff]   ;;  %v2155_v7 = vld [vmem:[%s2803_s22 + $0x10] sm:$0xff]  }
   0xd   :  { %1975 = vmatpush3.bf16.msra.mxu1 %v233_v1  ;;  %1976 = vmatprep.mubr.msk.bf16.mxu1 %vm218_vm1, %v2150_v2  ;;  %v2152_v4 = vld [vmem:[%s2804_s0] sm:$0xff]   ;;  %v2156_v8 = vld [vmem:[%s2803_s22 + $0x18] sm:$0xff]   ;;  %s2239_s22 = smov 32  }
   0xe   :  { %v2153_v5 = vld [vmem:[%s2805_s28] sm:$0xff]   ;;  %1964 = vmatprep.subr.bf16.mxu0 %v2152_v4  ;;  %v2154_v6 = vld [vmem:[%s2805_s28 + $0x8] sm:$0xff]   ;;  %v2157_v9 = vld [vmem:[%s2805_s28 + $0x10] sm:$0xff]   ;;  %1996 = vmatprep.subr.bf16.mxu1 %v2161_v24 }
   0xf   :  { %1965 = vmatpush3.bf16.msra.mxu0 %v2152_v4  ;;  %1966 = vmatprep.mubr.msk.bf16.mxu0 %vm103_vm2, %v2153_v5  ;;  %v2158_v10 = vld [vmem:[%s2805_s28 + $0x18] sm:$0xff]  }
  0x10   :  { %1977 = vmatmul.mubr.msk.bf16.vlgmr.msra.gmra.mxu1 %vm218_vm1, %v2151_v3  ;;  %1984 = vmatprep.subr.bf16.mxu0 %v2159_v11 }
  0x11   :  { %1980 = vmatprep.mubr.msk.bf16.mxu1 %vm218_vm1, %v2155_v7  ;;  %1997 = vmatpush3.bf16.msra.mxu1 %v2161_v24 }
  0x12   :  { %1967 = vmatmul.mubr.msk.bf16.vlgmr.msra.gmra.mxu0 %vm103_vm2, %v2154_v6  ;;  %1998 = vmatprep.subr.bf16.mxu1 %v2162_v31 }
  0x13   :  { %1970 = vmatprep.mubr.msk.bf16.mxu0 %vm103_vm2, %v2157_v9  ;;  %1985 = vmatpush3.bf16.msra.mxu0 %v2159_v11 }
  0x14   :  { %1986 = vmatprep.subr.bf16.mxu0 %v2160_v12 }
  0x15   :  { %1999 = vmatpush3.bf16.msra.mxu1 %v2162_v31 }
  0x16   :  { %2019 = vmatprep.subr.mxu1 %v2240_v25 }
  0x17   :  { %1987 = vmatpush3.bf16.msra.mxu0 %v2160_v12 }
  0x18   :  { %1981 = vmatmul.mubr.msk.bf16.gmra.mxu1 %vm218_vm1, %v2156_v8  ;;  %2008 = vmatprep.subr.mxu0 %v2240_v25 }
  0x1a   :  { %1971 = vmatmul.mubr.msk.bf16.gmra.mxu0 %vm103_vm2, %v2158_v10 }
  0xd0   :  { %v1978_v13 = vpop.f32.mrf.mxu1 }
  0xd1   :  { %312 = vrot.lane.b32.xlu1 %v1978_v13, %s2239_s22 }
  0xd2   :  { %v269_v14 = vpop.f32.mrf.mxu1  ;;  %v1968_v17 = vpop.f32.mrf.mxu0 }
  0xd3   :  { %308 = vrot.lane.b32.xlu0 %v269_v14, %s2239_s22  ;;  %v159_v19 = vadd.f32 %v1968_v17, %v1808_v15 }
  0xd4   :  { %v1979_v16 = vpop.f32.mrf.mxu1  ;;  %v150_v20 = vpop.f32.mrf.mxu0 }
  0xd5   :  { %314 = vrot.lane.b32.xlu1 %v1979_v16, %s2239_s22  ;;  %v2391_v21 = vadd.f32 %v1808_v15, %v150_v20  ;;  %v183_v26 = vmax.f32 %v159_v19, 0.0 }
  0xd6   :  { %v272_v18 = vpop.f32.mrf.mxu1  ;;  %v1969_v22 = vpop.f32.mrf.mxu0 }
  0xd7   :  { %310 = vrot.lane.b32.xlu0 %v272_v18, %s2239_s22  ;;  %v2393_v23 = vadd.f32 %v1969_v22, %v1808_v15  ;;  %v181_v28 = vmax.f32 %v2391_v21, 0.0 }
  0xd8   :  { %v153_v27 = vpop.f32.mrf.mxu0  ;;  %v1982_v53 = vpop.f32.mrf.mxu1 }
  0xd9   :  { %v184_v29 = vmax.f32 %v2393_v23, 0.0  ;;  %v154_v30 = vadd.f32 %v1808_v15, %v153_v27 }
  0xda   :  { %v1972_v37 = vpop.f32.mrf.mxu0  ;;  %v285_v59 = vpop.f32.mrf.mxu1 }
  0xdb   :  { %v182_v32 = vmax.f32 %v154_v30, 0.0  ;;  %v349_v33 = vpack.c.bf16 %v184_v29, %v183_v26  ;;  %v2421_v38 = vadd.f32 %v1972_v37, %v1808_v15 }
  0xdc   :  { %v166_v39 = vpop.f32.mrf.mxu0  ;;  %v1983_v2 = vpop.f32.mrf.mxu1 }
  0xdd   :  { %v348_v34 = vpack.c.bf16 %v182_v32, %v181_v28  ;;  %v2423_v40 = vadd.f32 %v1808_v15, %v166_v39  ;;  %v187_v43 = vmax.f32 %v2421_v38, 0.0 }
  0xde   :  { %v1973_v41 = vpop.f32.mrf.mxu0  ;;  %v288_v7 = vpop.f32.mrf.mxu1 }
  0xdf   :  { %1988 = vmatprep.mubr.msk.bf16.mxu0 %vm368_vm3, %v348_v34  ;;  %v2425_v42 = vadd.f32 %v1973_v41, %v1808_v15  ;;  %v185_v45 = vmax.f32 %v2423_v40, 0.0 }
  0xe0   :  { %1989 = vmatmul.mubr.msk.bf16.vlgmr.msra.gmra.mxu0 %vm368_vm3, %v349_v33  ;;  %v169_v44 = vpop.f32.mrf.mxu0 }
  0xe1   :  { %2009 = vmatpush3.msra.mxu0 %v2407_v35  ;;  %v188_v46 = vmax.f32 %v2425_v42, 0.0  ;;  %v2430_v47 = vadd.f32 %v1808_v15, %v169_v44 }
  0xe2   :  { %2010 = vmatprep.subr.mxu0 %v2240_v25 }
  0xe3   :  { %2011 = vmatpush3.msra.mxu0 %v2415_v36  ;;  %v186_v48 = vmax.f32 %v2430_v47, 0.0  ;;  %v351_v49 = vpack.c.bf16 %v188_v46, %v187_v43 }
  0xe4   :  { %2012 = vmatprep.subr.mxu0 %v2240_v25 }
  0xe5   :  { %v350_v50 = vpack.c.bf16 %v186_v48, %v185_v45  ;;  %2013 = vmatpush3.msra.mxu0 %v2438_v51 }
  0xe6   :  { %2014 = vmatprep.subr.mxu0 %v2240_v25 }
  0xe7   :  { %1992 = vmatprep.mubr.msk.bf16.mxu0 %vm368_vm3, %v350_v50  ;;  %2015 = vmatpush3.msra.mxu0 %v2445_v54 }
  0xe8   :  { %1993 = vmatmul.mubr.msk.bf16.gmra.mxu0 %vm368_vm3, %v351_v49  ;;  %2030 = vmatprep.subr.mxu0 %v2240_v25 }
  0xe9   :  { %2016 = vmatprep.mubr.msk.f32.mxu0 %vm2241_vm4, %v2240_v25 }
  0xf0   :  { %2017 = vmatmul.mubr.msk.f32.vlgmr.msra.gmra.mxu0 %vm368_vm3, %v587_v56 }
  0xf1   :  { %2031 = vmatpush3.msra.mxu0 %v2407_v35  ;;  %2038 = vmatprep.mubr.msk.f32.mxu0 %vm2241_vm4, %v2240_v25 }
  0xf2   :  { %2032 = vmatprep.subr.mxu0 %v2240_v25 }
  0xf3   :  { %2033 = vmatpush3.msra.mxu0 %v2415_v36 }
  0xf4   :  { %2034 = vmatprep.subr.mxu0 %v2240_v25 }
  0xf5   :  { %2035 = vmatpush3.msra.mxu0 %v2438_v51 }
  0xf6   :  { %2036 = vmatprep.subr.mxu0 %v2240_v25 }
  0xf7   :  { %2037 = vmatpush3.msra.mxu0 %v2445_v54 }
  0xf8   :  { %2052 = vmatprep.subr.mxu0 %v2240_v25 }
 0x143   :  { %v313_v52 = vpop.permute.xlu1 %312 }
 0x144   :  { %v334_v57 = vadd.f32 %v313_v52, %v159_v19 }
 0x145   :  { %v309_v55 = vpop.permute.xlu0 %308 }
 0x146   :  { %v332_v60 = vadd.f32 %v309_v55, %v2391_v21  ;;  %v342_v63 = vmax.f32 %v334_v57, 0.0  ;;  %v2496_v21 = vld [vmem:[%s2785_s9] ss:$0 sm:$0xff]  ;;  %s2243_s9 = smov 64  }
 0x147   :  { %v315_v58 = vpop.permute.xlu1 %314 }
 0x148   :  { %v335_v61 = vadd.f32 %v315_v58, %v2393_v23  ;;  %v340_v3 = vmax.f32 %v332_v60, 0.0 }
 0x149   :  { %v311_v62 = vpop.permute.xlu0 %310 }
 0x14a   :  { %v343_v0 = vmax.f32 %v335_v61, 0.0  ;;  %v333_v1 = vadd.f32 %v311_v62, %v154_v30  ;;  %v582_v30 = vlaneseq }
 0x14c   :  { %v455_v4 = vpack.c.bf16 %v343_v0, %v342_v63  ;;  %v341_v5 = vmax.f32 %v333_v1, 0.0  ;;  %v2499_v32 = vand.u32 127, %v582_v30 }
 0x14e   :  { %v454_v6 = vpack.c.bf16 %v341_v5, %v340_v3  ;;  %475 = vrot.lane.b32.xlu1 %v455_v4, %s2242_s2  ;;  %vm584_vm5 = vcmp.ge.s32.totalorder %v2499_v32, 64  ;;  %vm585_vm6 = vcmp.lt.s32.totalorder %v2499_v32, 96  ;;  %vm1778_vm8 = vcmp.lt.s32.totalorder %v2499_v32, 4 }
 0x14f   :  { %vm2507_vm7 = vmand %vm584_vm5, %vm585_vm6 }
 0x150   :  { %473 = vrot.lane.b32.xlu0 %v454_v6, %s2242_s2 }
 0x152   :  { %318 = vrot.lane.b32.xlu1 %v288_v7, %s2239_s22 }
 0x154   :  { %316 = vrot.lane.b32.xlu0 %v285_v59, %s2239_s22 }
 0x156   :  { %322 = vrot.lane.b32.xlu1 %v1983_v2, %s2239_s22 }
 0x158   :  { %320 = vrot.lane.b32.xlu0 %v1982_v53, %s2239_s22 }
 0x1a0   :  { %v1990_v8 = vpop.f32.mrf.mxu0 }
 0x1a1   :  { %448 = vst.msk [vmem:[#allocation3 + $0x10] sm:$0xff] %vm368_vm3, %v1990_v8 }
 0x1a2   :  { %v415_v9 = vpop.f32.mrf.mxu0 }
 0x1a3   :  { %446 = vst.msk [vmem:[#allocation3] sm:$0xff] %vm368_vm3, %v415_v9 }
 0x1a4   :  { %v1991_v10 = vpop.f32.mrf.mxu0 }
 0x1a5   :  { %449 = vst.msk [vmem:[#allocation3 + $0x18] sm:$0xff] %vm368_vm3, %v1991_v10 }
 0x1a6   :  { %v418_v11 = vpop.f32.mrf.mxu0 }
 0x1a7   :  { %447 = vst.msk [vmem:[#allocation3 + $0x8] sm:$0xff] %vm368_vm3, %v418_v11 }
 0x1a8   :  { %v1994_v14 = vpop.f32.mrf.mxu0 }
 0x1a9   :  { %452 = vst.msk [vmem:[#allocation3 + $0x30] sm:$0xff] %vm368_vm3, %v1994_v14 }
 0x1aa   :  { %v431_v15 = vpop.f32.mrf.mxu0 }
 0x1ab   :  { %450 = vst.msk [vmem:[#allocation3 + $0x20] sm:$0xff] %vm368_vm3, %v431_v15 }
 0x1ac   :  { %v1995_v16 = vpop.f32.mrf.mxu0 }
 0x1ad   :  { %453 = vst.msk [vmem:[#allocation3 + $0x38] sm:$0xff] %vm368_vm3, %v1995_v16 }
 0x1ae   :  { %v434_v17 = vpop.f32.mrf.mxu0 }
 0x1af   :  { %451 = vst.msk [vmem:[#allocation3 + $0x28] sm:$0xff] %vm368_vm3, %v434_v17 }
 0x1b0   :  { %v659_v18 = vpop.f32.mrf.mxu0 }
 0x1b2   :  { %v2018_v19 = vpop.f32.mrf.mxu0 }
 0x1c0   :  { %v476_v13 = vpop.permute.xlu1 %475 }
 0x1c2   :  { %v474_v12 = vpop.permute.xlu0 %473 }
 0x1c3   :  { %2000 = vmatprep.mubr.msk.bf16.mxu1 %vm368_vm3, %v474_v12 }
 0x1c4   :  { %2001 = vmatmul.mubr.msk.bf16.vlgmr.msra.gmra.mxu1 %vm368_vm3, %v476_v13  ;;  %v319_v31 = vpop.permute.xlu1 %318 }
 0x1c5   :  { %2020 = vmatpush3.msra.mxu1 %v2407_v35  ;;  %v337_v41 = vadd.f32 %v319_v31, %v2430_v47 }
 0x1c6   :  { %2021 = vmatprep.subr.mxu1 %v2240_v25  ;;  %v317_v29 = vpop.permute.xlu0 %316 }
 0x1c7   :  { %2022 = vmatpush3.msra.mxu1 %v2415_v36  ;;  %v336_v37 = vadd.f32 %v317_v29, %v2423_v40  ;;  %v345_v52 = vmax.f32 %v337_v41, 0.0 }
 0x1c8   :  { %2023 = vmatprep.subr.mxu1 %v2240_v25  ;;  %v323_v34 = vpop.permute.xlu1 %322 }
 0x1c9   :  { %2024 = vmatpush3.msra.mxu1 %v2438_v51  ;;  %v339_v43 = vadd.f32 %v323_v34, %v2425_v42  ;;  %v344_v48 = vmax.f32 %v336_v37, 0.0  ;;  %v588_v42 = vld [vmem:[%s2786_s3] sm:$0xff] }
 0x1ca   :  { %2025 = vmatprep.subr.mxu1 %v2240_v25  ;;  %v321_v33 = vpop.permute.xlu0 %320 }
 0x1cb   :  { %2026 = vmatpush3.msra.mxu1 %v2445_v54  ;;  %v338_v39 = vadd.f32 %v321_v33, %v2421_v38  ;;  %v347_v53 = vmax.f32 %v339_v43, 0.0  ;;  %v456_v38 = vpack.c.bf16 %v345_v52, %v344_v48 }
 0x1cc   :  { %2041 = vmatprep.subr.mxu1 %v2240_v25 }
 0x1cd   :  { %v346_v49 = vmax.f32 %v338_v39, 0.0 }
 0x1cf   :  { %v457_v40 = vpack.c.bf16 %v347_v53, %v346_v49 }
 0x284   :  { %v2491_v20 = vpop.f32.mrf.mxu1 }
 0x286   :  { %v539_v22 = vpop.f32.mrf.mxu1 }
 0x287   :  { %v540_v23 = vadd.f32 %v2496_v21, %v539_v22 }
 0x288   :  { %v2539_v0 = vpop.f32.mrf.mxu1 }
 0x289   :  { %v663_v24 = vadd.f32 %v659_v18, %v540_v23  ;;  %v551_v53 = vadd.f32 %v2539_v0, %v2496_v21 }
 0x28a   :  { %v542_v1 = vpop.f32.mrf.mxu1 }
 0x28b   :  { %v1840_v26 = vmul.f32 -1.442695, %v663_v24  ;;  %v543_v6 = vadd.f32 %v2496_v21, %v542_v1 }
 0x28d   :  { %2175 = vpow2.f32 %v1840_v26 }
 0x28e   :  { %2177 = vtanh.f32 %v663_v24 }
 0x29a   :  { %v2176_v27 = vpop.eup %2175 }
 0x29b   :  { %v668_v28 = vadd.f32 1.0, %v2176_v27  ;;  %v2178_v45 = vpop.eup %2177  ;;  %v548_v27 = vadd.f32 %v2491_v20, %v2496_v21 }
 0x29d   :  { %2179 = vrcp.f32 %v668_v28 }
 0x2aa   :  { %v2180_v46 = vpop.eup %2179 }
 0x2ab   :  { %v671_v50 = vsel %vm2507_vm7, %v2178_v45, %v2180_v46 }
 0x2ac   :  { %674 = vrot.lane.b32.xlu1 %v671_v50, %s2243_s9  ;;  %672 = vrot.lane.b32.xlu0 %v671_v50, %s2242_s2 }
 0x2b0   :  { %479 = vrot.lane.b32.xlu1 %v457_v40, %s2242_s2  ;;  %477 = vrot.lane.b32.xlu0 %v456_v38, %s2242_s2 }
 0x2b4   :  { %676 = vrot.lane.b32.xlu0 %v671_v50, %s2239_s22 }
 0x31e   :  { %v675_v47 = vpop.permute.xlu1 %674  ;;  %v673_v55 = vpop.permute.xlu0 %672 }
 0x31f   :  { %v679_v56 = vmul.f32 %v675_v47, %v671_v50  ;;  %v678_v57 = vmul.f32 %v673_v55, %v588_v42 }
 0x321   :  { %v680_v58 = vadd.f32 %v679_v56, %v678_v57 }
 0x322   :  { %v480_v59 = vpop.permute.xlu1 %479  ;;  %v478_v60 = vpop.permute.xlu0 %477 }
 0x323   :  { %2181 = vtanh.f32 %v680_v58  ;;  %2004 = vmatprep.mubr.msk.bf16.mxu1 %vm368_vm3, %v478_v60 }
 0x324   :  { %2005 = vmatmul.mubr.msk.bf16.gmra.mxu1 %vm368_vm3, %v480_v59 }
 0x325   :  { %2027 = vmatprep.mubr.msk.f32.mxu1 %vm2241_vm4, %v2240_v25 }
 0x326   :  { %v677_v62 = vpop.permute.xlu0 %676 }
 0x330   :  { %v2182_v61 = vpop.eup %2181 }
 0x331   :  { %v2525_v63 = vmul.f32 %v2182_v61, %v677_v62 }
 0x333   :  { %2028 = vmatmul.mubr.msk.f32.vlgmr.msra.gmra.mxu1 %vm368_vm3, %v2525_v63 }
 0x334   :  { %2042 = vmatpush3.msra.mxu1 %v2407_v35  ;;  %2049 = vmatprep.mubr.msk.f32.mxu1 %vm2241_vm4, %v2240_v25 }
 0x335   :  { %2043 = vmatprep.subr.mxu1 %v2240_v25 }
 0x336   :  { %2044 = vmatpush3.msra.mxu1 %v2415_v36 }
 0x337   :  { %2045 = vmatprep.subr.mxu1 %v2240_v25 }
 0x338   :  { %2046 = vmatpush3.msra.mxu1 %v2438_v51 }
 0x339   :  { %2047 = vmatprep.subr.mxu1 %v2240_v25 }
 0x33a   :  { %2048 = vmatpush3.msra.mxu1 %v2445_v54 }
 0x33b   :  { %2063 = vmatprep.subr.mxu1 %v2240_v25 }
 0x3e4   :  { %v2541_v2 = vpop.f32.mrf.mxu1 }
 0x3e6   :  { %v2543_v3 = vpop.f32.mrf.mxu1 }
 0x3e8   :  { %v2545_v4 = vpop.f32.mrf.mxu1 }
 0x3ea   :  { %v2547_v5 = vpop.f32.mrf.mxu1 }
 0x3f3   :  { %v755_v7 = vpop.f32.mrf.mxu1 }
 0x3f4   :  { %v759_v8 = vadd.f32 %v755_v7, %v543_v6 }
 0x3f5   :  { %v2029_v9 = vpop.f32.mrf.mxu1 }
 0x3f6   :  { %v1842_v10 = vmul.f32 -1.442695, %v759_v8  ;;  %v556_v9 = vadd.f32 %v2496_v21, %v2543_v3 }
 0x3f8   :  { %2183 = vpow2.f32 %v1842_v10 }
 0x3f9   :  { %2185 = vtanh.f32 %v759_v8 }
 0x405   :  { %v2184_v11 = vpop.eup %2183 }
 0x406   :  { %v764_v12 = vadd.f32 1.0, %v2184_v11  ;;  %v2186_v13 = vpop.eup %2185 }
 0x408   :  { %2187 = vrcp.f32 %v764_v12 }
 0x415   :  { %v2188_v14 = vpop.eup %2187 }
 0x416   :  { %v767_v15 = vsel %vm2507_vm7, %v2186_v13, %v2188_v14 }
 0x417   :  { %770 = vrot.lane.b32.xlu0 %v767_v15, %s2243_s9  ;;  %768 = vrot.lane.b32.xlu1 %v767_v15, %s2242_s2 }
 0x41b   :  { %772 = vrot.lane.b32.xlu1 %v767_v15, %s2239_s22 }
 0x489   :  { %v771_v16 = vpop.permute.xlu0 %770  ;;  %v769_v17 = vpop.permute.xlu1 %768 }
 0x48a   :  { %v775_v18 = vmul.f32 %v771_v16, %v767_v15  ;;  %v774_v19 = vmul.f32 %v769_v17, %v680_v58 }
 0x48c   :  { %v776_v22 = vadd.f32 %v775_v18, %v774_v19 }
 0x48d   :  { %v773_v24 = vpop.permute.xlu1 %772 }
 0x48e   :  { %2189 = vtanh.f32 %v776_v22 }
 0x49b   :  { %v2190_v23 = vpop.eup %2189 }
 0x49c   :  { %v2555_v26 = vmul.f32 %v2190_v23, %v773_v24 }
 0x49e   :  { %2039 = vmatmul.mubr.msk.f32.vlgmr.msra.gmra.mxu0 %vm368_vm3, %v2555_v26 }
 0x49f   :  { %2053 = vmatpush3.msra.mxu0 %v2407_v35  ;;  %2060 = vmatprep.mubr.msk.f32.mxu0 %vm2241_vm4, %v2240_v25 }
 0x4a0   :  { %2054 = vmatprep.subr.mxu0 %v2240_v25 }
 0x4a1   :  { %2055 = vmatpush3.msra.mxu0 %v2415_v36 }
 0x4a2   :  { %2056 = vmatprep.subr.mxu0 %v2240_v25 }
 0x4a3   :  { %2057 = vmatpush3.msra.mxu0 %v2438_v51 }
 0x4a4   :  { %2058 = vmatprep.subr.mxu0 %v2240_v25 }
 0x4a5   :  { %2059 = vmatpush3.msra.mxu0 %v2445_v54 }
 0x4a6   :  { %2074 = vmatprep.subr.mxu0 %v2240_v25 }
 0x55e   :  { %v851_v28 = vpop.f32.mrf.mxu0 }
 0x55f   :  { %v855_v29 = vadd.f32 %v851_v28, %v548_v27 }
 0x560   :  { %v2040_v30 = vpop.f32.mrf.mxu0 }
 0x561   :  { %v1844_v31 = vmul.f32 -1.442695, %v855_v29  ;;  %v559_v30 = vadd.f32 %v2496_v21, %v2547_v5 }
 0x563   :  { %2191 = vpow2.f32 %v1844_v31 }
 0x564   :  { %2193 = vtanh.f32 %v855_v29 }
 0x570   :  { %v2192_v33 = vpop.eup %2191 }
 0x571   :  { %v860_v34 = vadd.f32 1.0, %v2192_v33  ;;  %v2194_v37 = vpop.eup %2193 }
 0x573   :  { %2195 = vrcp.f32 %v860_v34 }
 0x580   :  { %v2196_v39 = vpop.eup %2195 }
 0x581   :  { %v863_v41 = vsel %vm2507_vm7, %v2194_v37, %v2196_v39 }
 0x582   :  { %866 = vrot.lane.b32.xlu1 %v863_v41, %s2243_s9  ;;  %864 = vrot.lane.b32.xlu0 %v863_v41, %s2242_s2 }
 0x586   :  { %868 = vrot.lane.b32.xlu0 %v863_v41, %s2239_s22 }
 0x5f4   :  { %v867_v20 = vpop.permute.xlu1 %866  ;;  %v865_v43 = vpop.permute.xlu0 %864 }
 0x5f5   :  { %v871_v45 = vmul.f32 %v867_v20, %v863_v41  ;;  %v870_v46 = vmul.f32 %v865_v43, %v776_v22 }
 0x5f7   :  { %v872_v48 = vadd.f32 %v871_v45, %v870_v46 }
 0x5f8   :  { %v869_v50 = vpop.permute.xlu0 %868 }
 0x5f9   :  { %2197 = vtanh.f32 %v872_v48 }
 0x606   :  { %v2198_v49 = vpop.eup %2197 }
 0x607   :  { %v2576_v52 = vmul.f32 %v2198_v49, %v869_v50  ;;  %v2164_v50 = vld [vmem:[%s2787_s11 + $0x30] sm:$0xff]  }
 0x609   :  { %2050 = vmatmul.mubr.msk.f32.vlgmr.msra.gmra.mxu1 %vm368_vm3, %v2576_v52 }
 0x60a   :  { %2064 = vmatpush3.msra.mxu1 %v2407_v35  ;;  %2071 = vmatprep.mubr.msk.f32.mxu1 %vm2241_vm4, %v2240_v25 }
 0x60b   :  { %2065 = vmatprep.subr.mxu1 %v2240_v25 }
 0x60c   :  { %2066 = vmatpush3.msra.mxu1 %v2415_v36 }
 0x60d   :  { %2067 = vmatprep.subr.mxu1 %v2240_v25 }
 0x60e   :  { %2068 = vmatpush3.msra.mxu1 %v2438_v51 }
 0x60f   :  { %2069 = vmatprep.subr.mxu1 %v2240_v25 }
 0x610   :  { %2070 = vmatpush3.msra.mxu1 %v2445_v54 }
 0x611   :  { %2085 = vmatprep.subr.mxu1 %v2240_v25 }
 0x6c9   :  { %v947_v38 = vpop.f32.mrf.mxu1 }
 0x6ca   :  { %v951_v40 = vadd.f32 %v947_v38, %v551_v53  ;;  %v1366_v53 = vpack.c.bf16 %v2555_v26, %v2525_v63  ;;  %v2165_v38 = vld [vmem:[%s2787_s11 + $0x28] sm:$0xff]   ;;  %v2167_v63 = vld [vmem:[%s2787_s11 + $0x18] sm:$0xff]   ;;  %v2168_v26 = vld [vmem:[%s2787_s11 + $0x10] sm:$0xff]  }
 0x6cb   :  { %v2051_v42 = vpop.f32.mrf.mxu1 }
 0x6cc   :  { %v1846_v47 = vmul.f32 -1.442695, %v951_v40  ;;  %v2169_v42 = vld [vmem:[%s2787_s11 + $0x8] sm:$0xff]  }
 0x6ce   :  { %2199 = vpow2.f32 %v1846_v47  ;;  %v2170_v47 = vld [vmem:[%s2787_s11] sm:$0xff]  }
 0x6cf   :  { %2201 = vtanh.f32 %v951_v40  ;;  %v2166_v40 = vld [vmem:[%s2787_s11 + $0x20] sm:$0xff]  }
 0x6db   :  { %v2200_v55 = vpop.eup %2199 }
 0x6dc   :  { %v956_v56 = vadd.f32 1.0, %v2200_v55  ;;  %v2202_v57 = vpop.eup %2201 }
 0x6de   :  { %2203 = vrcp.f32 %v956_v56 }
 0x6eb   :  { %v2204_v58 = vpop.eup %2203 }
 0x6ec   :  { %v959_v59 = vsel %vm2507_vm7, %v2202_v57, %v2204_v58  ;;  %v564_v57 = vadd.f32 %v2541_v2, %v2496_v21  ;;  %v2171_v2 = vld [vmem:[%s2788_s13 + $0x8] sm:$0xff]  }
 0x6ed   :  { %962 = vrot.lane.b32.xlu0 %v959_v59, %s2243_s9  ;;  %960 = vrot.lane.b32.xlu1 %v959_v59, %s2242_s2 }
 0x6f1   :  { %964 = vrot.lane.b32.xlu1 %v959_v59, %s2239_s22 }
 0x75f   :  { %v963_v60 = vpop.permute.xlu0 %962  ;;  %v961_v61 = vpop.permute.xlu1 %960 }
 0x760   :  { %v967_v62 = vmul.f32 %v963_v60, %v959_v59  ;;  %v966_v0 = vmul.f32 %v961_v61, %v872_v48 }
 0x762   :  { %v968_v1 = vadd.f32 %v967_v62, %v966_v0 }
 0x763   :  { %v965_v7 = vpop.permute.xlu1 %964 }
 0x764   :  { %2205 = vtanh.f32 %v968_v1 }
 0x771   :  { %v2206_v6 = vpop.eup %2205 }
 0x772   :  { %v2597_v8 = vmul.f32 %v2206_v6, %v965_v7 }
 0x774   :  { %2061 = vmatmul.mubr.msk.f32.vlgmr.msra.gmra.mxu0 %vm368_vm3, %v2597_v8  ;;  %v1367_v55 = vpack.c.bf16 %v2597_v8, %v2576_v52 }
 0x775   :  { %2075 = vmatpush3.msra.mxu0 %v2407_v35  ;;  %2082 = vmatprep.mubr.msk.f32.mxu0 %vm2241_vm4, %v2240_v25 }
 0x776   :  { %2076 = vmatprep.subr.mxu0 %v2240_v25 }
 0x777   :  { %2077 = vmatpush3.msra.mxu0 %v2415_v36 }
 0x778   :  { %2078 = vmatprep.subr.mxu0 %v2240_v25 }
 0x779   :  { %2079 = vmatpush3.msra.mxu0 %v2438_v51 }
 0x77a   :  { %2080 = vmatprep.subr.mxu0 %v2240_v25 }
 0x77b   :  { %2081 = vmatpush3.msra.mxu0 %v2445_v54 }
 0x834   :  { %v1043_v10 = vpop.f32.mrf.mxu0 }
 0x835   :  { %v1047_v11 = vadd.f32 %v1043_v10, %v556_v9 }
 0x836   :  { %v2062_v12 = vpop.f32.mrf.mxu0 }
 0x837   :  { %v1848_v13 = vmul.f32 -1.442695, %v1047_v11 }
 0x839   :  { %2207 = vpow2.f32 %v1848_v13 }
 0x83a   :  { %2209 = vtanh.f32 %v1047_v11 }
 0x846   :  { %v2208_v14 = vpop.eup %2207 }
 0x847   :  { %v1052_v15 = vadd.f32 1.0, %v2208_v14  ;;  %v2210_v16 = vpop.eup %2209 }
 0x849   :  { %2211 = vrcp.f32 %v1052_v15 }
 0x856   :  { %v2212_v17 = vpop.eup %2211 }
 0x857   :  { %v1055_v18 = vsel %vm2507_vm7, %v2210_v16, %v2212_v17  ;;  %v1371_v16 = vld [vmem:[#allocation3 + $0x8] sm:$0xff] }
 0x858   :  { %1058 = vrot.lane.b32.xlu1 %v1055_v18, %s2243_s9  ;;  %1056 = vrot.lane.b32.xlu0 %v1055_v18, %s2242_s2 }
 0x85c   :  { %1060 = vrot.lane.b32.xlu0 %v1055_v18, %s2239_s22 }
 0x8ca   :  { %v1059_v3 = vpop.permute.xlu1 %1058  ;;  %v1057_v19 = vpop.permute.xlu0 %1056 }
 0x8cb   :  { %v1063_v22 = vmul.f32 %v1059_v3, %v1055_v18  ;;  %v1062_v23 = vmul.f32 %v1057_v19, %v968_v1  ;;  %v1370_v18 = vld [vmem:[#allocation3] sm:$0xff] }
 0x8cc   :  { %v2680_v19 = vld [vmem:[%s2789_s12] ss:$0 sm:$0xff] }
 0x8cd   :  { %v1064_v24 = vadd.f32 %v1063_v22, %v1062_v23 }
 0x8ce   :  { %v1061_v28 = vpop.permute.xlu0 %1060 }
 0x8cf   :  { %2213 = vtanh.f32 %v1064_v24 }
 0x8dc   :  { %v2214_v27 = vpop.eup %2213 }
 0x8dd   :  { %v2617_v29 = vmul.f32 %v2214_v27, %v1061_v28  ;;  %v1372_v28 = vld [vmem:[#allocation3 + $0x10] sm:$0xff] }
 0x8df   :  { %2072 = vmatmul.mubr.msk.f32.vlgmr.msra.gmra.mxu1 %vm368_vm3, %v2617_v29 }
 0x8e0   :  { %2086 = vmatpush3.msra.mxu1 %v2407_v35  ;;  %2093 = vmatprep.mubr.msk.f32.mxu1 %vm2241_vm4, %v2240_v25 }
 0x8e1   :  { %2087 = vmatprep.subr.mxu1 %v2240_v25 }
 0x8e2   :  { %2088 = vmatpush3.msra.mxu1 %v2415_v36 }
 0x8e3   :  { %2089 = vmatprep.subr.mxu1 %v2240_v25 }
 0x8e4   :  { %2090 = vmatpush3.msra.mxu1 %v2438_v51 }
 0x8e5   :  { %2091 = vmatprep.subr.mxu1 %v2240_v25  ;;  %v2163_v25 = vld [vmem:[%s2787_s11 + $0x38] sm:$0xff]  }
 0x8e6   :  { %2092 = vmatpush3.msra.mxu1 %v2445_v54  ;;  %2096 = vmatprep.subr.bf16.mxu0 %v2163_v25 }
 0x8e7   :  { %2120 = vmatprep.subr.bf16.mxu1 %v2171_v2 }
 0x99f   :  { %v1139_v31 = vpop.f32.mrf.mxu1 }
 0x9a0   :  { %v1143_v35 = vadd.f32 %v1139_v31, %v559_v30 }
 0x9a1   :  { %v2073_v33 = vpop.f32.mrf.mxu1 }
 0x9a2   :  { %v1850_v34 = vmul.f32 -1.442695, %v1143_v35 }
 0x9a4   :  { %2215 = vpow2.f32 %v1850_v34 }
 0x9a5   :  { %2217 = vtanh.f32 %v1143_v35 }
 0x9b1   :  { %v2216_v37 = vpop.eup %2215 }
 0x9b2   :  { %v1148_v39 = vadd.f32 1.0, %v2216_v37  ;;  %v2218_v36 = vpop.eup %2217 }
 0x9b4   :  { %2219 = vrcp.f32 %v1148_v39  ;;  %v2172_v39 = vld [vmem:[%s2788_s13] sm:$0xff]  }
 0x9c1   :  { %v2220_v41 = vpop.eup %2219 }
 0x9c2   :  { %v1151_v51 = vsel %vm2507_vm7, %v2218_v36, %v2220_v41 }
 0x9c3   :  { %1154 = vrot.lane.b32.xlu0 %v1151_v51, %s2243_s9  ;;  %1152 = vrot.lane.b32.xlu1 %v1151_v51, %s2242_s2 }
 0x9c7   :  { %1156 = vrot.lane.b32.xlu1 %v1151_v51, %s2239_s22 }
 0xa35   :  { %v1155_v54 = vpop.permute.xlu0 %1154  ;;  %v1153_v5 = vpop.permute.xlu1 %1152 }
 0xa36   :  { %v1159_v20 = vmul.f32 %v1155_v54, %v1151_v51  ;;  %v1158_v43 = vmul.f32 %v1153_v5, %v1064_v24  ;;  %v1373_v24 = vld [vmem:[#allocation3 + $0x18] sm:$0xff]  ;;  %v567_v5 = vadd.f32 %v2545_v4, %v2496_v21 }
 0xa38   :  { %v1160_v45 = vadd.f32 %v1159_v20, %v1158_v43 }
 0xa39   :  { %v1157_v48 = vpop.permute.xlu1 %1156 }
 0xa3a   :  { %2221 = vtanh.f32 %v1160_v45 }
 0xa47   :  { %v2222_v46 = vpop.eup %2221 }
 0xa48   :  { %v1162_v49 = vmul.f32 %v2222_v46, %v1157_v48 }
 0xa4a   :  { %2083 = vmatmul.mubr.msk.f32.vlgmr.msra.gmra.mxu0 %vm368_vm3, %v1162_v49  ;;  %v1368_v56 = vpack.c.bf16 %v1162_v49, %v2617_v29 }
 0xa4b   :  { %2097 = vmatpush3.bf16.msra.mxu0 %v2163_v25  ;;  %2112 = vmatprep.mubr.bf16.mxu0 %v1366_v53 }
 0xa4c   :  { %2098 = vmatprep.subr.bf16.mxu0 %v2164_v50 }
 0xa4f   :  { %2099 = vmatpush3.bf16.msra.mxu0 %v2164_v50 }
 0xa50   :  { %2100 = vmatprep.subr.bf16.mxu0 %v2165_v38 }
 0xa53   :  { %2101 = vmatpush3.bf16.msra.mxu0 %v2165_v38 }
 0xa54   :  { %2102 = vmatprep.subr.bf16.mxu0 %v2166_v40 }
 0xa57   :  { %2103 = vmatpush3.bf16.msra.mxu0 %v2166_v40 }
 0xa58   :  { %2104 = vmatprep.subr.bf16.mxu0 %v2167_v63 }
 0xa5b   :  { %2105 = vmatpush3.bf16.msra.mxu0 %v2167_v63 }
 0xa5c   :  { %2106 = vmatprep.subr.bf16.mxu0 %v2168_v26 }
 0xa5f   :  { %2107 = vmatpush3.bf16.msra.mxu0 %v2168_v26 }
 0xa60   :  { %2108 = vmatprep.subr.bf16.mxu0 %v2169_v42 }
 0xa63   :  { %2109 = vmatpush3.bf16.msra.mxu0 %v2169_v42 }
 0xa64   :  { %2110 = vmatprep.subr.bf16.mxu0 %v2170_v47 }
 0xa67   :  { %2111 = vmatpush3.bf16.msra.mxu0 %v2170_v47 }
 0xa6a   :  { %2113 = vmatmul.mubr.bf16.vlgmr.msra.gmra.mxu0 %v1367_v55 }
 0xa6b   :  { %2116 = vmatprep.mubr.bf16.mxu0 %v1368_v56  ;;  %v2173_v56 = vld [vmem:[%s2792_s15 + $0x8] sm:$0xff]  }
 0xb0a   :  { %v1235_v58 = vpop.f32.mrf.mxu0 }
 0xb0b   :  { %v1239_v59 = vadd.f32 %v1235_v58, %v564_v57  ;;  %v2174_v57 = vld [vmem:[%s2792_s15] sm:$0xff]  }
 0xb0c   :  { %v2084_v60 = vpop.f32.mrf.mxu0 }
 0xb0d   :  { %v1852_v61 = vmul.f32 -1.442695, %v1239_v59 }
 0xb0f   :  { %2223 = vpow2.f32 %v1852_v61 }
 0xb10   :  { %2225 = vtanh.f32 %v1239_v59 }
 0xb1c   :  { %v2224_v62 = vpop.eup %2223 }
 0xb1d   :  { %v1244_v0 = vadd.f32 1.0, %v2224_v62  ;;  %v2226_v1 = vpop.eup %2225  ;;  %v1374_v62 = vld [vmem:[#allocation3 + $0x20] sm:$0xff] }
 0xb1f   :  { %2227 = vrcp.f32 %v1244_v0 }
 0xb2a   :  { %v2114_v7 = vpop.f32.mrf.mxu0 }
 0xb2b   :  { %v1509_v30 = vadd.f32 %v2114_v7, %v1372_v28  ;;  %v1377_v7 = vld [vmem:[#allocation3 + $0x38] sm:$0xff] }
 0xb2c   :  { %v2228_v6 = vpop.eup %2227  ;;  %v1476_v8 = vpop.f32.mrf.mxu0 }
 0xb2d   :  { %v1247_v52 = vsel %vm2507_vm7, %v2226_v1, %v2228_v6  ;;  %v1507_v3 = vadd.f32 %v1476_v8, %v1370_v18  ;;  %v1524_v41 = vadd.f32 %v2680_v19, %v1509_v30  ;;  %v1376_v1 = vld [vmem:[#allocation3 + $0x30] sm:$0xff] }
 0xb2e   :  { %1250 = vrot.lane.b32.xlu1 %v1247_v52, %s2243_s9  ;;  %1248 = vrot.lane.b32.xlu0 %v1247_v52, %s2242_s2  ;;  %v2115_v11 = vpop.f32.mrf.mxu0 }
 0xb2f   :  { %v1522_v23 = vadd.f32 %v2680_v19, %v1507_v3  ;;  %v1510_v27 = vadd.f32 %v2115_v11, %v1373_v24  ;;  %v1532_v25 = vmax.f32 %v1524_v41, 0.0  ;;  %v1375_v11 = vld [vmem:[#allocation3 + $0x28] sm:$0xff] }
 0xb30   :  { %v1479_v15 = vpop.f32.mrf.mxu0 }
 0xb31   :  { %v1508_v17 = vadd.f32 %v1479_v15, %v1371_v16  ;;  %v1530_v35 = vmax.f32 %v1522_v23, 0.0  ;;  %v1525_v34 = vadd.f32 %v2680_v19, %v1510_v27 }
 0xb32   :  { %1252 = vrot.lane.b32.xlu0 %v1247_v52, %s2239_s22 }
 0xb33   :  { %v1523_v22 = vadd.f32 %v2680_v19, %v1508_v17  ;;  %v1533_v51 = vmax.f32 %v1525_v34, 0.0 }
 0xb35   :  { %v1531_v29 = vmax.f32 %v1523_v22, 0.0  ;;  %v1539_v54 = vpack.c.bf16 %v1533_v51, %v1532_v25 }
 0xb37   :  { %v1538_v36 = vpack.c.bf16 %v1531_v29, %v1530_v35 }
 0xba0   :  { %v1251_v9 = vpop.permute.xlu1 %1250  ;;  %v1249_v10 = vpop.permute.xlu0 %1248 }
 0xba1   :  { %v1255_v12 = vmul.f32 %v1251_v9, %v1247_v52  ;;  %v1254_v13 = vmul.f32 %v1249_v10, %v1160_v45  ;;  %v1864_v10 = vld [vmem:[%s2793_s14] ss:$0 sm:$0xff] }
 0xba3   :  { %v1256_v14 = vadd.f32 %v1255_v12, %v1254_v13 }
 0xba4   :  { %v1253_v33 = vpop.permute.xlu0 %1252 }
 0xba5   :  { %2229 = vtanh.f32 %v1256_v14 }
 0xbb2   :  { %v2230_v31 = vpop.eup %2229 }
 0xbb3   :  { %v1258_v37 = vmul.f32 %v2230_v31, %v1253_v33 }
 0xbb5   :  { %2094 = vmatmul.mubr.msk.f32.vlgmr.msra.gmra.mxu1 %vm368_vm3, %v1258_v37 }
 0xbb6   :  { %2121 = vmatpush3.bf16.msra.mxu1 %v2171_v2  ;;  %2124 = vmatprep.mubr.msk.bf16.mxu1 %vm368_vm3, %v1538_v36 }
 0xbb7   :  { %2122 = vmatprep.subr.bf16.mxu1 %v2172_v39 }
 0xbba   :  { %2123 = vmatpush3.bf16.msra.mxu1 %v2172_v39 }
 0xbbb   :  { %2132 = vmatprep.subr.bf16.mxu1 %v2173_v56 }
 0xbbd   :  { %2125 = vmatmul.mubr.msk.bf16.vlgmr.msra.gmra.mxu1 %vm368_vm3, %v1539_v54 }
 0xbbe   :  { %2133 = vmatpush3.bf16.msra.mxu1 %v2173_v56 }
 0xbbf   :  { %2134 = vmatprep.subr.bf16.mxu1 %v2174_v57 }
 0xbc2   :  { %2135 = vmatpush3.bf16.msra.mxu1 %v2174_v57 }
 0xc75   :  { %v1331_v20 = vpop.f32.mrf.mxu1 }
 0xc76   :  { %v1335_v43 = vadd.f32 %v1331_v20, %v567_v5 }
 0xc77   :  { %v2095_v45 = vpop.f32.mrf.mxu1 }
 0xc78   :  { %v1854_v46 = vmul.f32 -1.442695, %v1335_v43 }
 0xc7a   :  { %2231 = vpow2.f32 %v1854_v46 }
 0xc7b   :  { %2233 = vtanh.f32 %v1335_v43  ;;  %v1871_v43 = vld [vmem:[%s2794_s16] ss:$0 sm:$0xff] }
 0xc7d   :  { %v2126_v58 = vpop.f32.mrf.mxu1 }
 0xc7e   :  { %v1620_v34 = vadd.f32 %v2126_v58, %v1864_v10 }
 0xc7f   :  { %v1611_v59 = vpop.f32.mrf.mxu1 }
 0xc80   :  { %v1612_v18 = vadd.f32 %v1864_v10, %v1611_v59  ;;  %v1644_v39 = vmax.f32 %v1620_v34, 0.0 }
 0xc81   :  { %v2127_v60 = vpop.f32.mrf.mxu1 }
 0xc82   :  { %v1642_v29 = vmax.f32 %v1612_v18, 0.0  ;;  %v1623_v31 = vadd.f32 %v2127_v60, %v1864_v10 }
 0xc83   :  { %v1614_v52 = vpop.f32.mrf.mxu1 }
 0xc84   :  { %v1615_v13 = vadd.f32 %v1864_v10, %v1614_v52 }
 0xc86   :  { %v1643_v23 = vmax.f32 %v1615_v13, 0.0 }
 0xc87   :  { %v2232_v48 = vpop.eup %2231 }
 0xc88   :  { %v1340_v49 = vadd.f32 1.0, %v2232_v48  ;;  %v2234_v50 = vpop.eup %2233  ;;  %v1650_v33 = vpack.c.bf16 %v1643_v23, %v1642_v29 }
 0xc8a   :  { %2235 = vrcp.f32 %v1340_v49 }
 0xc97   :  { %v2236_v53 = vpop.eup %2235 }
 0xc98   :  { %v1343_v38 = vsel %vm2507_vm7, %v2234_v50, %v2236_v53 }
 0xc99   :  { %1346 = vrot.lane.b32.xlu0 %v1343_v38, %s2243_s9  ;;  %1344 = vrot.lane.b32.xlu1 %v1343_v38, %s2242_s2 }
 0xc9d   :  { %1348 = vrot.lane.b32.xlu1 %v1343_v38, %s2239_s22 }
 0xd0b   :  { %v1347_v21 = vpop.permute.xlu0 %1346  ;;  %v1345_v4 = vpop.permute.xlu1 %1344 }
 0xd0c   :  { %v1351_v40 = vmul.f32 %v1347_v21, %v1343_v38  ;;  %v1350_v63 = vmul.f32 %v1345_v4, %v1256_v14 }
 0xd0e   :  { %v1352_v26 = vadd.f32 %v1351_v40, %v1350_v63 }
 0xd0f   :  { %v1349_v47 = vpop.permute.xlu1 %1348 }
 0xd10   :  { %2237 = vtanh.f32 %v1352_v26  ;;  %1357 = vst [vmem:[%s2790_s19] sm:$0xff] %v1352_v26 }
 0xd1d   :  { %v2238_v42 = vpop.eup %2237 }
 0xd1e   :  { %v1354_v44 = vmul.f32 %v2238_v42, %v1349_v47 }
 0xd20   :  { %1356 = vst [vmem:[%s2791_s18] sm:$0xff] %v1354_v44  ;;  %v1369_v55 = vpack.c.bf16 %v1354_v44, %v1258_v37  ;;  %v1645_v37 = vmax.f32 %v1623_v31, 0.0 }
 0xd22   :  { %2117 = vmatmul.mubr.bf16.gmra.mxu0 %v1369_v55 }
 0xde2   :  { %v2118_v61 = vpop.f32.mrf.mxu0 }
 0xde3   :  { %v1513_v2 = vadd.f32 %v2118_v61, %v1376_v1 }
 0xde4   :  { %v1492_v0 = vpop.f32.mrf.mxu0 }
 0xde5   :  { %v1511_v6 = vadd.f32 %v1492_v0, %v1374_v62  ;;  %v1528_v17 = vadd.f32 %v2680_v19, %v1513_v2 }
 0xde6   :  { %v2119_v8 = vpop.f32.mrf.mxu0 }
 0xde7   :  { %v1514_v9 = vadd.f32 %v2119_v8, %v1377_v7  ;;  %v1526_v14 = vadd.f32 %v2680_v19, %v1511_v6  ;;  %v1536_v28 = vmax.f32 %v1528_v17, 0.0 }
 0xde8   :  { %v1495_v12 = vpop.f32.mrf.mxu0 }
 0xde9   :  { %v1529_v15 = vadd.f32 %v2680_v19, %v1514_v9  ;;  %v1512_v16 = vadd.f32 %v1495_v12, %v1375_v11  ;;  %v1534_v24 = vmax.f32 %v1526_v14, 0.0 }
 0xdeb   :  { %v1527_v3 = vadd.f32 %v2680_v19, %v1512_v16  ;;  %v1537_v22 = vmax.f32 %v1529_v15, 0.0  ;;  %v1651_v19 = vpack.c.bf16 %v1645_v37, %v1644_v39 }
 0xded   :  { %v1535_v27 = vmax.f32 %v1527_v3, 0.0  ;;  %v1541_v35 = vpack.c.bf16 %v1537_v22, %v1536_v28 }
 0xdef   :  { %v1540_v30 = vpack.c.bf16 %v1535_v27, %v1534_v24 }
 0xdf1   :  { %2128 = vmatprep.mubr.msk.bf16.mxu1 %vm368_vm3, %v1540_v30 }
 0xdf2   :  { %2129 = vmatmul.mubr.msk.bf16.gmra.mxu1 %vm368_vm3, %v1541_v35 }
 0xdf3   :  { %2136 = vmatprep.mubr.msk.bf16.mxu1 %vm368_vm3, %v1650_v33 }
 0xdfa   :  { %2137 = vmatmul.mubr.msk.bf16.vlgmr.msra.gmra.mxu1 %vm368_vm3, %v1651_v19 }
 0xeb2   :  { %v2130_v36 = vpop.f32.mrf.mxu1 }
 0xeb3   :  { %v1636_v5 = vadd.f32 %v2130_v36, %v1864_v10 }
 0xeb4   :  { %v1627_v41 = vpop.f32.mrf.mxu1 }
 0xeb5   :  { %v1628_v25 = vadd.f32 %v1864_v10, %v1627_v41  ;;  %v1648_v38 = vmax.f32 %v1636_v5, 0.0 }
 0xeb6   :  { %v2131_v51 = vpop.f32.mrf.mxu1 }
 0xeb7   :  { %v1639_v54 = vadd.f32 %v2131_v51, %v1864_v10  ;;  %v1646_v49 = vmax.f32 %v1628_v25, 0.0 }
 0xeb8   :  { %v1630_v20 = vpop.f32.mrf.mxu1 }
 0xeb9   :  { %v1631_v45 = vadd.f32 %v1864_v10, %v1630_v20  ;;  %v1649_v46 = vmax.f32 %v1639_v54, 0.0 }
 0xeba   :  { %v2138_v48 = vpop.f32.mrf.mxu1 }
 0xebb   :  { %v1647_v50 = vmax.f32 %v1631_v45, 0.0  ;;  %v1732_v53 = vadd.f32 %v2138_v48, %v1871_v43  ;;  %v1653_v26 = vpack.c.bf16 %v1649_v46, %v1648_v38 }
 0xebc   :  { %v1723_v21 = vpop.f32.mrf.mxu1 }
 0xebd   :  { %v1652_v4 = vpack.c.bf16 %v1647_v50, %v1646_v49  ;;  %v1756_v40 = vmax.f32 %v1732_v53, 0.0  ;;  %v1724_v63 = vadd.f32 %v1871_v43, %v1723_v21 }
 0xebe   :  { %v2139_v42 = vpop.f32.mrf.mxu1 }
 0xebf   :  { %v1764_v47 = vmax.f32 %v1756_v40, -20.0  ;;  %v1754_v44 = vmax.f32 %v1724_v63, 0.0  ;;  %v1735_v55 = vadd.f32 %v2139_v42, %v1871_v43  ;;  %2140 = vmatprep.mubr.msk.bf16.mxu1 %vm368_vm3, %v1652_v4 }
 0xec0   :  { %v1726_v56 = vpop.f32.mrf.mxu1  ;;  %2141 = vmatmul.mubr.msk.bf16.gmra.mxu1 %vm368_vm3, %v1653_v26 }
 0xec1   :  { %v1772_v57 = vmin.f32 %v1764_v47, 2.0  ;;  %v1762_v58 = vmax.f32 %v1754_v44, -20.0  ;;  %v1757_v59 = vmax.f32 %v1735_v55, 0.0  ;;  %v1727_v60 = vadd.f32 %v1871_v43, %v1726_v56 }
 0xec3   :  { %v1781_v61 = vsel %vm1778_vm8, %v1732_v53, %v1772_v57  ;;  %v1770_v62 = vmin.f32 %v1762_v58, 2.0  ;;  %v1765_v0 = vmax.f32 %v1757_v59, -20.0  ;;  %v1755_v1 = vmax.f32 %v1727_v60, 0.0 }
 0xec4   :  { %1790 = vst.msk [vmem:[%s2795_s17 + $0x10] sm:$0xff] %vm1787_vm9, %v1781_v61 }
 0xec5   :  { %v1779_v6 = vsel %vm1778_vm8, %v1724_v63, %v1770_v62  ;;  %v1773_v52 = vmin.f32 %v1765_v0, 2.0  ;;  %v1763_v2 = vmax.f32 %v1755_v1, -20.0 }
 0xec6   :  { %1788 = vst.msk [vmem:[%s2795_s17] sm:$0xff] %vm1787_vm9, %v1779_v6 }
 0xec7   :  { %v1782_v7 = vsel %vm1778_vm8, %v1735_v55, %v1773_v52  ;;  %v1771_v8 = vmin.f32 %v1763_v2, 2.0 }
 0xec8   :  { %1791 = vst.msk [vmem:[%s2795_s17 + $0x18] sm:$0xff] %vm1787_vm9, %v1782_v7 }
 0xec9   :  { %v1780_v9 = vsel %vm1778_vm8, %v1727_v60, %v1771_v8 }
 0xeca   :  { %1789 = vst.msk [vmem:[%s2795_s17 + $0x8] sm:$0xff] %vm1787_vm9, %v1780_v9 }
 0xf80   :  { %v2142_v10 = vpop.f32.mrf.mxu1 }
 0xf81   :  { %v1748_v11 = vadd.f32 %v2142_v10, %v1871_v43 }
 0xf82   :  { %v1739_v12 = vpop.f32.mrf.mxu1 }
 0xf83   :  { %v1760_v13 = vmax.f32 %v1748_v11, 0.0  ;;  %v1740_v14 = vadd.f32 %v1871_v43, %v1739_v12 }
 0xf84   :  { %v2143_v15 = vpop.f32.mrf.mxu1 }
 0xf85   :  { %v1768_v16 = vmax.f32 %v1760_v13, -20.0  ;;  %v1758_v17 = vmax.f32 %v1740_v14, 0.0  ;;  %v1751_v18 = vadd.f32 %v2143_v15, %v1871_v43 }
 0xf86   :  { %v1742_v3 = vpop.f32.mrf.mxu1 }
 0xf87   :  { %v1776_v22 = vmin.f32 %v1768_v16, 2.0  ;;  %v1766_v23 = vmax.f32 %v1758_v17, -20.0  ;;  %v1761_v24 = vmax.f32 %v1751_v18, 0.0  ;;  %v1743_v27 = vadd.f32 %v1871_v43, %v1742_v3 }
 0xf89   :  { %v1785_v28 = vsel %vm1778_vm8, %v1748_v11, %v1776_v22  ;;  %v1774_v29 = vmin.f32 %v1766_v23, 2.0  ;;  %v1769_v30 = vmax.f32 %v1761_v24, -20.0  ;;  %v1759_v31 = vmax.f32 %v1743_v27, 0.0 }
 0xf8a   :  { %1794 = vst.msk [vmem:[%s2795_s17 + $0x30] sm:$0xff] %vm1787_vm9, %v1785_v28 }
 0xf8b   :  { %v1783_v35 = vsel %vm1778_vm8, %v1740_v14, %v1774_v29  ;;  %v1777_v33 = vmin.f32 %v1769_v30, 2.0  ;;  %v1767_v34 = vmax.f32 %v1759_v31, -20.0 }
 0xf8c   :  { %1792 = vst.msk [vmem:[%s2795_s17 + $0x20] sm:$0xff] %vm1787_vm9, %v1783_v35 }
 0xf8d   :  { %v1786_v37 = vsel %vm1778_vm8, %v1751_v18, %v1777_v33  ;;  %v1775_v39 = vmin.f32 %v1767_v34, 2.0 }
 0xf8e   :  { %1795 = vst.msk [vmem:[%s2795_s17 + $0x38] sm:$0xff] %vm1787_vm9, %v1786_v37 }
 0xf8f   :  { %v1784_v19 = vsel %vm1778_vm8, %v1743_v27, %v1775_v39 }
 0xf90   :  { %1793 = vst.msk [vmem:[%s2795_s17 + $0x28] sm:$0xff] %vm1787_vm9, %v1784_v19 }

</bundles_post_ra>
